<compile_context>
chip_gen: v7x
topology: tpu7x:2x2x1
jax: 0.10.0
libtpu: 0.0.40
codegen_flags: <defaults>
</compile_context>

<pallas_src>
import functools

import jax
import jax.numpy as jnp
from jax.experimental import pallas as pl
from jax.experimental.pallas import tpu as pltpu


def _round_up(x, m):
    return (x + m - 1) // m * m


def baseline_kernel(ids_ref, table_ref, w_ref, b_ref, o_ref, pooled_ref,
                    *, tb, seq_len, vocab):
    """One batch block (TB rows) per grid step.

    ids_ref    : (B_pad, S) int32, SMEM (scalar prefetch)
    table_ref  : (V, D)     f32, VMEM (full embedding table, resident)
    w_ref      : (D, C_pad) f32, VMEM
    b_ref      : (1, C_pad) f32, VMEM
    o_ref      : (TB, C_pad) f32, VMEM output block for this batch block
    pooled_ref : (TB, D)    f32, VMEM scratch holding the max-pooled rows
    """
    gb = pl.program_id(0)

    # In-VMEM gather + fused max-pool: for every batch row in this block, read
    # the S embedding rows straight out of the resident table (dynamic sublane
    # slices) and fold the running max — no DMAs, no (S, D) intermediate.
    for b in range(tb):
        row = gb * tb + b
        tok0 = jnp.minimum(jnp.maximum(ids_ref[row, 0], 0), vocab - 1)
        acc = table_ref[pl.ds(tok0, 1), :]                       # (1, D)
        for s in range(1, seq_len):
            tok = jnp.minimum(jnp.maximum(ids_ref[row, s], 0), vocab - 1)
            acc = jnp.maximum(acc, table_ref[pl.ds(tok, 1), :])
        pooled_ref[pl.ds(b, 1), :] = acc

    # Linear layer on the full (TB, D) tile: one MXU matmul, then a
    # sublane+lane-dense (TB, C_pad) store.
    out = (
        jnp.dot(pooled_ref[...], w_ref[...], preferred_element_type=jnp.float32)
        + b_ref[...]
    )                                                            # (TB, C_pad)
    o_ref[...] = out.astype(o_ref.dtype)


def prepare_params(w_t, bias):
    """Pad linear params to a full 128-lane class width ONCE (not per call)."""
    D, C = w_t.shape
    c_pad = _round_up(C, 128)
    w_pad = jnp.zeros((D, c_pad), w_t.dtype).at[:, :C].set(w_t)
    b_pad = jnp.zeros((1, c_pad), bias.dtype).at[:, :C].set(bias.reshape(1, -1))
    return w_pad, b_pad


@functools.partial(jax.jit, static_argnames=("num_classes",))
def baseline_forward(ids, emb_table, w_pad, b_pad, *, num_classes):
    """ids: (B, S) int; emb_table: (V, D) f32; w_pad: (D, C_pad); b_pad: (1, C_pad)."""
    B, S = ids.shape
    V, D = emb_table.shape
    c_pad = w_pad.shape[1]

    # Batch blocking: pad B to a multiple of 8 (sublane) and pick TB so the
    # grid keeps >= 2 steps when B allows (v7x has 2 TensorCores).
    b_rows = _round_up(B, 8)
    tb = min(128, b_rows)
    if b_rows // tb < 2 and b_rows >= 16:
        tb = max(8, (b_rows // 2) // 8 * 8)
    b_rows = _round_up(b_rows, tb)
    grid = (b_rows // tb,)

    ids_padded = jnp.zeros((b_rows, S), jnp.int32).at[:B, :].set(
        ids.astype(jnp.int32))

    kernel = functools.partial(baseline_kernel, tb=tb, seq_len=S, vocab=V)

    # Actual VMEM footprint (resident table + params + double-buffered output
    # + pooled scratch), with generous headroom; cap for v7x's 64 MiB VMEM.
    footprint = (V * D + D * c_pad + c_pad + 2 * tb * c_pad + tb * D) * 4
    vmem_limit = min(max(4 * footprint, 16 * 1024 * 1024), 64 * 1024 * 1024)

    grid_spec = pltpu.PrefetchScalarGridSpec(
        num_scalar_prefetch=1,                               # ids -> SMEM
        grid=grid,
        in_specs=[
            pl.BlockSpec((V, D), lambda i, ids: (0, 0)),     # resident table
            pl.BlockSpec((D, c_pad), lambda i, ids: (0, 0)), # W (full, VMEM)
            pl.BlockSpec((1, c_pad), lambda i, ids: (0, 0)), # bias (full, VMEM)
        ],
        out_specs=pl.BlockSpec((tb, c_pad), lambda i, ids: (i, 0)),
        scratch_shapes=[pltpu.VMEM((tb, D), jnp.float32)],   # pooled rows
    )

    out_padded = pl.pallas_call(
        kernel,
        out_shape=jax.ShapeDtypeStruct((b_rows, c_pad), jnp.float32),
        grid_spec=grid_spec,
        compiler_params=pltpu.CompilerParams(
            dimension_semantics=("parallel",),   # batch blocks shard across TCs
            vmem_limit_bytes=vmem_limit,
        ),
    )(ids_padded, emb_table, w_pad, b_pad)

    # Drop the batch padding and the lane padding on the class dim.
    return out_padded[:B, :num_classes]


if __name__ == "__main__":
    # Small shapes consistent with the module's forward.
    vocab_size, embedding_dim, num_classes = 64, 32, 8
    batch, seq = 2, 8

    key = jax.random.PRNGKey(0)
    k_ids, k_emb, k_w, k_b = jax.random.split(key, 4)

    ids = jax.random.randint(k_ids, (batch, seq), 0, vocab_size, dtype=jnp.int32)
    emb_table = jax.random.normal(k_emb, (vocab_size, embedding_dim), jnp.float32)
    # PyTorch Linear weight is (C, D); the kernel uses it transposed as (D, C).
    w = jax.random.normal(k_w, (num_classes, embedding_dim), jnp.float32) * 0.1
    b = jax.random.normal(k_b, (num_classes,), jnp.float32) * 0.1

    w_pad, b_pad = prepare_params(w.T, b)            # padded once, reused per call
    out = baseline_forward(ids, emb_table, w_pad, b_pad, num_classes=num_classes)
    out = jax.block_until_ready(out)

    # Pure-JAX reference check (matches the PyTorch forward).
    ref = jnp.max(emb_table[ids], axis=1) @ w.T + b
    assert out.shape == (batch, num_classes)
    assert jnp.allclose(out, ref, atol=1e-5, rtol=1e-5)

    print("KERNEL_OK")
</pallas_src>

<mosaic_0001>
module attributes {stable_mosaic.version = 11 : i64} {
  func.func @baseline_kernel(%arg0: i32, %arg1: memref<8x8xi32, #tpu.memory_space<smem>>, %arg2: memref<64x32xf32, #tpu.memory_space<vmem>>, %arg3: memref<32x128xf32, #tpu.memory_space<vmem>>, %arg4: memref<1x128xf32, #tpu.memory_space<vmem>>, %arg5: memref<8x128xf32, #tpu.memory_space<vmem>>, %arg6: memref<8x32xf32, #tpu.memory_space<vmem>>) attributes {dimension_semantics = [#tpu.dimension_semantics<parallel>], iteration_bounds = array<i64: 1>, scalar_prefetch = 1 : i64, scratch_operands = 1 : i64, tpu.core_type = #tpu.core_type<tc>, window_params = [{pipeline_mode = #tpu.pipeline_mode<synchronous>, transform_indices = @transform_0, window_bounds = array<i64: 64, 32>}, {pipeline_mode = #tpu.pipeline_mode<synchronous>, transform_indices = @transform_1, window_bounds = array<i64: 32, 128>}, {pipeline_mode = #tpu.pipeline_mode<synchronous>, transform_indices = @transform_2, window_bounds = array<i64: 1, 128>}, {transform_indices = @transform_3, window_bounds = array<i64: 8, 128>}]} {
    %c8_i32 = arith.constant 8 : i32
    %0 = arith.muli %arg0, %c8_i32 : i32
    %c0_i32 = arith.constant 0 : i32
    %1 = arith.addi %0, %c0_i32 : i32
    %2 = arith.index_cast %1 : i32 to index
    %c0 = arith.constant 0 : index
    %3 = memref.load %arg1[%2, %c0] : memref<8x8xi32, #tpu.memory_space<smem>>
    %c0_i32_0 = arith.constant 0 : i32
    %4 = arith.maxsi %3, %c0_i32_0 : i32
    %c63_i32 = arith.constant 63 : i32
    %5 = arith.minsi %4, %c63_i32 : i32
    %6 = arith.index_cast %5 : i32 to index
    %c0_1 = arith.constant 0 : index
    %7 = vector.load %arg2[%6, %c0_1] : memref<64x32xf32, #tpu.memory_space<vmem>>, vector<1x32xf32>
    %8 = arith.index_cast %1 : i32 to index
    %c1 = arith.constant 1 : index
    %9 = memref.load %arg1[%8, %c1] : memref<8x8xi32, #tpu.memory_space<smem>>
    %c0_i32_2 = arith.constant 0 : i32
    %10 = arith.maxsi %9, %c0_i32_2 : i32
    %c63_i32_3 = arith.constant 63 : i32
    %11 = arith.minsi %10, %c63_i32_3 : i32
    %12 = arith.index_cast %11 : i32 to index
    %c0_4 = arith.constant 0 : index
    %13 = vector.load %arg2[%12, %c0_4] : memref<64x32xf32, #tpu.memory_space<vmem>>, vector<1x32xf32>
    %14 = arith.maximumf %7, %13 : vector<1x32xf32>
    %15 = arith.index_cast %1 : i32 to index
    %c2 = arith.constant 2 : index
    %16 = memref.load %arg1[%15, %c2] : memref<8x8xi32, #tpu.memory_space<smem>>
    %c0_i32_5 = arith.constant 0 : i32
    %17 = arith.maxsi %16, %c0_i32_5 : i32
    %c63_i32_6 = arith.constant 63 : i32
    %18 = arith.minsi %17, %c63_i32_6 : i32
    %19 = arith.index_cast %18 : i32 to index
    %c0_7 = arith.constant 0 : index
    %20 = vector.load %arg2[%19, %c0_7] : memref<64x32xf32, #tpu.memory_space<vmem>>, vector<1x32xf32>
    %21 = arith.maximumf %14, %20 : vector<1x32xf32>
    %22 = arith.index_cast %1 : i32 to index
    %c3 = arith.constant 3 : index
    %23 = memref.load %arg1[%22, %c3] : memref<8x8xi32, #tpu.memory_space<smem>>
    %c0_i32_8 = arith.constant 0 : i32
    %24 = arith.maxsi %23, %c0_i32_8 : i32
    %c63_i32_9 = arith.constant 63 : i32
    %25 = arith.minsi %24, %c63_i32_9 : i32
    %26 = arith.index_cast %25 : i32 to index
    %c0_10 = arith.constant 0 : index
    %27 = vector.load %arg2[%26, %c0_10] : memref<64x32xf32, #tpu.memory_space<vmem>>, vector<1x32xf32>
    %28 = arith.maximumf %21, %27 : vector<1x32xf32>
    %29 = arith.index_cast %1 : i32 to index
    %c4 = arith.constant 4 : index
    %30 = memref.load %arg1[%29, %c4] : memref<8x8xi32, #tpu.memory_space<smem>>
    %c0_i32_11 = arith.constant 0 : i32
    %31 = arith.maxsi %30, %c0_i32_11 : i32
    %c63_i32_12 = arith.constant 63 : i32
    %32 = arith.minsi %31, %c63_i32_12 : i32
    %33 = arith.index_cast %32 : i32 to index
    %c0_13 = arith.constant 0 : index
    %34 = vector.load %arg2[%33, %c0_13] : memref<64x32xf32, #tpu.memory_space<vmem>>, vector<1x32xf32>
    %35 = arith.maximumf %28, %34 : vector<1x32xf32>
    %36 = arith.index_cast %1 : i32 to index
    %c5 = arith.constant 5 : index
    %37 = memref.load %arg1[%36, %c5] : memref<8x8xi32, #tpu.memory_space<smem>>
    %c0_i32_14 = arith.constant 0 : i32
    %38 = arith.maxsi %37, %c0_i32_14 : i32
    %c63_i32_15 = arith.constant 63 : i32
    %39 = arith.minsi %38, %c63_i32_15 : i32
    %40 = arith.index_cast %39 : i32 to index
    %c0_16 = arith.constant 0 : index
    %41 = vector.load %arg2[%40, %c0_16] : memref<64x32xf32, #tpu.memory_space<vmem>>, vector<1x32xf32>
    %42 = arith.maximumf %35, %41 : vector<1x32xf32>
    %43 = arith.index_cast %1 : i32 to index
    %c6 = arith.constant 6 : index
    %44 = memref.load %arg1[%43, %c6] : memref<8x8xi32, #tpu.memory_space<smem>>
    %c0_i32_17 = arith.constant 0 : i32
    %45 = arith.maxsi %44, %c0_i32_17 : i32
    %c63_i32_18 = arith.constant 63 : i32
    %46 = arith.minsi %45, %c63_i32_18 : i32
    %47 = arith.index_cast %46 : i32 to index
    %c0_19 = arith.constant 0 : index
    %48 = vector.load %arg2[%47, %c0_19] : memref<64x32xf32, #tpu.memory_space<vmem>>, vector<1x32xf32>
    %49 = arith.maximumf %42, %48 : vector<1x32xf32>
    %50 = arith.index_cast %1 : i32 to index
    %c7 = arith.constant 7 : index
    %51 = memref.load %arg1[%50, %c7] : memref<8x8xi32, #tpu.memory_space<smem>>
    %c0_i32_20 = arith.constant 0 : i32
    %52 = arith.maxsi %51, %c0_i32_20 : i32
    %c63_i32_21 = arith.constant 63 : i32
    %53 = arith.minsi %52, %c63_i32_21 : i32
    %54 = arith.index_cast %53 : i32 to index
    %c0_22 = arith.constant 0 : index
    %55 = vector.load %arg2[%54, %c0_22] : memref<64x32xf32, #tpu.memory_space<vmem>>, vector<1x32xf32>
    %56 = arith.maximumf %49, %55 : vector<1x32xf32>
    %c0_23 = arith.constant 0 : index
    %c0_24 = arith.constant 0 : index
    %57 = vector.load %arg6[%c0_23, %c0_24] : memref<8x32xf32, #tpu.memory_space<vmem>>, vector<1x32xf32>
    tpu.vector_store %arg6[%c0_23, %c0_24], %56 {strides = array<i32>} : memref<8x32xf32, #tpu.memory_space<vmem>>, vector<1x32xf32>,
    %c8_i32_25 = arith.constant 8 : i32
    %58 = arith.muli %arg0, %c8_i32_25 : i32
    %c1_i32 = arith.constant 1 : i32
    %59 = arith.addi %58, %c1_i32 : i32
    %60 = arith.index_cast %59 : i32 to index
    %c0_26 = arith.constant 0 : index
    %61 = memref.load %arg1[%60, %c0_26] : memref<8x8xi32, #tpu.memory_space<smem>>
    %c0_i32_27 = arith.constant 0 : i32
    %62 = arith.maxsi %61, %c0_i32_27 : i32
    %c63_i32_28 = arith.constant 63 : i32
    %63 = arith.minsi %62, %c63_i32_28 : i32
    %64 = arith.index_cast %63 : i32 to index
    %c0_29 = arith.constant 0 : index
    %65 = vector.load %arg2[%64, %c0_29] : memref<64x32xf32, #tpu.memory_space<vmem>>, vector<1x32xf32>
    %66 = arith.index_cast %59 : i32 to index
    %c1_30 = arith.constant 1 : index
    %67 = memref.load %arg1[%66, %c1_30] : memref<8x8xi32, #tpu.memory_space<smem>>
    %c0_i32_31 = arith.constant 0 : i32
    %68 = arith.maxsi %67, %c0_i32_31 : i32
    %c63_i32_32 = arith.constant 63 : i32
    %69 = arith.minsi %68, %c63_i32_32 : i32
    %70 = arith.index_cast %69 : i32 to index
    %c0_33 = arith.constant 0 : index
    %71 = vector.load %arg2[%70, %c0_33] : memref<64x32xf32, #tpu.memory_space<vmem>>, vector<1x32xf32>
    %72 = arith.maximumf %65, %71 : vector<1x32xf32>
    %73 = arith.index_cast %59 : i32 to index
    %c2_34 = arith.constant 2 : index
    %74 = memref.load %arg1[%73, %c2_34] : memref<8x8xi32, #tpu.memory_space<smem>>
    %c0_i32_35 = arith.constant 0 : i32
    %75 = arith.maxsi %74, %c0_i32_35 : i32
    %c63_i32_36 = arith.constant 63 : i32
    %76 = arith.minsi %75, %c63_i32_36 : i32
    %77 = arith.index_cast %76 : i32 to index
    %c0_37 = arith.constant 0 : index
    %78 = vector.load %arg2[%77, %c0_37] : memref<64x32xf32, #tpu.memory_space<vmem>>, vector<1x32xf32>
    %79 = arith.maximumf %72, %78 : vector<1x32xf32>
    %80 = arith.index_cast %59 : i32 to index
    %c3_38 = arith.constant 3 : index
    %81 = memref.load %arg1[%80, %c3_38] : memref<8x8xi32, #tpu.memory_space<smem>>
    %c0_i32_39 = arith.constant 0 : i32
    %82 = arith.maxsi %81, %c0_i32_39 : i32
    %c63_i32_40 = arith.constant 63 : i32
    %83 = arith.minsi %82, %c63_i32_40 : i32
    %84 = arith.index_cast %83 : i32 to index
    %c0_41 = arith.constant 0 : index
    %85 = vector.load %arg2[%84, %c0_41] : memref<64x32xf32, #tpu.memory_space<vmem>>, vector<1x32xf32>
    %86 = arith.maximumf %79, %85 : vector<1x32xf32>
    %87 = arith.index_cast %59 : i32 to index
    %c4_42 = arith.constant 4 : index
    %88 = memref.load %arg1[%87, %c4_42] : memref<8x8xi32, #tpu.memory_space<smem>>
    %c0_i32_43 = arith.constant 0 : i32
    %89 = arith.maxsi %88, %c0_i32_43 : i32
    %c63_i32_44 = arith.constant 63 : i32
    %90 = arith.minsi %89, %c63_i32_44 : i32
    %91 = arith.index_cast %90 : i32 to index
    %c0_45 = arith.constant 0 : index
    %92 = vector.load %arg2[%91, %c0_45] : memref<64x32xf32, #tpu.memory_space<vmem>>, vector<1x32xf32>
    %93 = arith.maximumf %86, %92 : vector<1x32xf32>
    %94 = arith.index_cast %59 : i32 to index
    %c5_46 = arith.constant 5 : index
    %95 = memref.load %arg1[%94, %c5_46] : memref<8x8xi32, #tpu.memory_space<smem>>
    %c0_i32_47 = arith.constant 0 : i32
    %96 = arith.maxsi %95, %c0_i32_47 : i32
    %c63_i32_48 = arith.constant 63 : i32
    %97 = arith.minsi %96, %c63_i32_48 : i32
    %98 = arith.index_cast %97 : i32 to index
    %c0_49 = arith.constant 0 : index
    %99 = vector.load %arg2[%98, %c0_49] : memref<64x32xf32, #tpu.memory_space<vmem>>, vector<1x32xf32>
    %100 = arith.maximumf %93, %99 : vector<1x32xf32>
    %101 = arith.index_cast %59 : i32 to index
    %c6_50 = arith.constant 6 : index
    %102 = memref.load %arg1[%101, %c6_50] : memref<8x8xi32, #tpu.memory_space<smem>>
    %c0_i32_51 = arith.constant 0 : i32
    %103 = arith.maxsi %102, %c0_i32_51 : i32
    %c63_i32_52 = arith.constant 63 : i32
    %104 = arith.minsi %103, %c63_i32_52 : i32
    %105 = arith.index_cast %104 : i32 to index
    %c0_53 = arith.constant 0 : index
    %106 = vector.load %arg2[%105, %c0_53] : memref<64x32xf32, #tpu.memory_space<vmem>>, vector<1x32xf32>
    %107 = arith.maximumf %100, %106 : vector<1x32xf32>
    %108 = arith.index_cast %59 : i32 to index
    %c7_54 = arith.constant 7 : index
    %109 = memref.load %arg1[%108, %c7_54] : memref<8x8xi32, #tpu.memory_space<smem>>
    %c0_i32_55 = arith.constant 0 : i32
    %110 = arith.maxsi %109, %c0_i32_55 : i32
    %c63_i32_56 = arith.constant 63 : i32
    %111 = arith.minsi %110, %c63_i32_56 : i32
    %112 = arith.index_cast %111 : i32 to index
    %c0_57 = arith.constant 0 : index
    %113 = vector.load %arg2[%112, %c0_57] : memref<64x32xf32, #tpu.memory_space<vmem>>, vector<1x32xf32>
    %114 = arith.maximumf %107, %113 : vector<1x32xf32>
    %c1_58 = arith.constant 1 : index
    %c0_59 = arith.constant 0 : index
    %115 = vector.load %arg6[%c1_58, %c0_59] : memref<8x32xf32, #tpu.memory_space<vmem>>, vector<1x32xf32>
    tpu.vector_store %arg6[%c1_58, %c0_59], %114 {strides = array<i32>} : memref<8x32xf32, #tpu.memory_space<vmem>>, vector<1x32xf32>,
    %c8_i32_60 = arith.constant 8 : i32
    %116 = arith.muli %arg0, %c8_i32_60 : i32
    %c2_i32 = arith.constant 2 : i32
    %117 = arith.addi %116, %c2_i32 : i32
    %118 = arith.index_cast %117 : i32 to index
    %c0_61 = arith.constant 0 : index
    %119 = memref.load %arg1[%118, %c0_61] : memref<8x8xi32, #tpu.memory_space<smem>>
    %c0_i32_62 = arith.constant 0 : i32
    %120 = arith.maxsi %119, %c0_i32_62 : i32
    %c63_i32_63 = arith.constant 63 : i32
    %121 = arith.minsi %120, %c63_i32_63 : i32
    %122 = arith.index_cast %121 : i32 to index
    %c0_64 = arith.constant 0 : index
    %123 = vector.load %arg2[%122, %c0_64] : memref<64x32xf32, #tpu.memory_space<vmem>>, vector<1x32xf32>
    %124 = arith.index_cast %117 : i32 to index
    %c1_65 = arith.constant 1 : index
    %125 = memref.load %arg1[%124, %c1_65] : memref<8x8xi32, #tpu.memory_space<smem>>
    %c0_i32_66 = arith.constant 0 : i32
    %126 = arith.maxsi %125, %c0_i32_66 : i32
    %c63_i32_67 = arith.constant 63 : i32
    %127 = arith.minsi %126, %c63_i32_67 : i32
    %128 = arith.index_cast %127 : i32 to index
    %c0_68 = arith.constant 0 : index
    %129 = vector.load %arg2[%128, %c0_68] : memref<64x32xf32, #tpu.memory_space<vmem>>, vector<1x32xf32>
    %130 = arith.maximumf %123, %129 : vector<1x32xf32>
    %131 = arith.index_cast %117 : i32 to index
    %c2_69 = arith.constant 2 : index
    %132 = memref.load %arg1[%131, %c2_69] : memref<8x8xi32, #tpu.memory_space<smem>>
    %c0_i32_70 = arith.constant 0 : i32
    %133 = arith.maxsi %132, %c0_i32_70 : i32
    %c63_i32_71 = arith.constant 63 : i32
    %134 = arith.minsi %133, %c63_i32_71 : i32
    %135 = arith.index_cast %134 : i32 to index
    %c0_72 = arith.constant 0 : index
    %136 = vector.load %arg2[%135, %c0_72] : memref<64x32xf32, #tpu.memory_space<vmem>>, vector<1x32xf32>
    %137 = arith.maximumf %130, %136 : vector<1x32xf32>
    %138 = arith.index_cast %117 : i32 to index
    %c3_73 = arith.constant 3 : index
    %139 = memref.load %arg1[%138, %c3_73] : memref<8x8xi32, #tpu.memory_space<smem>>
    %c0_i32_74 = arith.constant 0 : i32
    %140 = arith.maxsi %139, %c0_i32_74 : i32
    %c63_i32_75 = arith.constant 63 : i32
    %141 = arith.minsi %140, %c63_i32_75 : i32
    %142 = arith.index_cast %141 : i32 to index
    %c0_76 = arith.constant 0 : index
    %143 = vector.load %arg2[%142, %c0_76] : memref<64x32xf32, #tpu.memory_space<vmem>>, vector<1x32xf32>
    %144 = arith.maximumf %137, %143 : vector<1x32xf32>
    %145 = arith.index_cast %117 : i32 to index
    %c4_77 = arith.constant 4 : index
    %146 = memref.load %arg1[%145, %c4_77] : memref<8x8xi32, #tpu.memory_space<smem>>
    %c0_i32_78 = arith.constant 0 : i32
    %147 = arith.maxsi %146, %c0_i32_78 : i32
    %c63_i32_79 = arith.constant 63 : i32
    %148 = arith.minsi %147, %c63_i32_79 : i32
    %149 = arith.index_cast %148 : i32 to index
    %c0_80 = arith.constant 0 : index
    %150 = vector.load %arg2[%149, %c0_80] : memref<64x32xf32, #tpu.memory_space<vmem>>, vector<1x32xf32>
    %151 = arith.maximumf %144, %150 : vector<1x32xf32>
    %152 = arith.index_cast %117 : i32 to index
    %c5_81 = arith.constant 5 : index
    %153 = memref.load %arg1[%152, %c5_81] : memref<8x8xi32, #tpu.memory_space<smem>>
    %c0_i32_82 = arith.constant 0 : i32
    %154 = arith.maxsi %153, %c0_i32_82 : i32
    %c63_i32_83 = arith.constant 63 : i32
    %155 = arith.minsi %154, %c63_i32_83 : i32
    %156 = arith.index_cast %155 : i32 to index
    %c0_84 = arith.constant 0 : index
    %157 = vector.load %arg2[%156, %c0_84] : memref<64x32xf32, #tpu.memory_space<vmem>>, vector<1x32xf32>
    %158 = arith.maximumf %151, %157 : vector<1x32xf32>
    %159 = arith.index_cast %117 : i32 to index
    %c6_85 = arith.constant 6 : index
    %160 = memref.load %arg1[%159, %c6_85] : memref<8x8xi32, #tpu.memory_space<smem>>
    %c0_i32_86 = arith.constant 0 : i32
    %161 = arith.maxsi %160, %c0_i32_86 : i32
    %c63_i32_87 = arith.constant 63 : i32
    %162 = arith.minsi %161, %c63_i32_87 : i32
    %163 = arith.index_cast %162 : i32 to index
    %c0_88 = arith.constant 0 : index
    %164 = vector.load %arg2[%163, %c0_88] : memref<64x32xf32, #tpu.memory_space<vmem>>, vector<1x32xf32>
    %165 = arith.maximumf %158, %164 : vector<1x32xf32>
    %166 = arith.index_cast %117 : i32 to index
    %c7_89 = arith.constant 7 : index
    %167 = memref.load %arg1[%166, %c7_89] : memref<8x8xi32, #tpu.memory_space<smem>>
    %c0_i32_90 = arith.constant 0 : i32
    %168 = arith.maxsi %167, %c0_i32_90 : i32
    %c63_i32_91 = arith.constant 63 : i32
    %169 = arith.minsi %168, %c63_i32_91 : i32
    %170 = arith.index_cast %169 : i32 to index
    %c0_92 = arith.constant 0 : index
    %171 = vector.load %arg2[%170, %c0_92] : memref<64x32xf32, #tpu.memory_space<vmem>>, vector<1x32xf32>
    %172 = arith.maximumf %165, %171 : vector<1x32xf32>
    %c2_93 = arith.constant 2 : index
    %c0_94 = arith.constant 0 : index
    %173 = vector.load %arg6[%c2_93, %c0_94] : memref<8x32xf32, #tpu.memory_space<vmem>>, vector<1x32xf32>
    tpu.vector_store %arg6[%c2_93, %c0_94], %172 {strides = array<i32>} : memref<8x32xf32, #tpu.memory_space<vmem>>, vector<1x32xf32>,
    %c8_i32_95 = arith.constant 8 : i32
    %174 = arith.muli %arg0, %c8_i32_95 : i32
    %c3_i32 = arith.constant 3 : i32
    %175 = arith.addi %174, %c3_i32 : i32
    %176 = arith.index_cast %175 : i32 to index
    %c0_96 = arith.constant 0 : index
    %177 = memref.load %arg1[%176, %c0_96] : memref<8x8xi32, #tpu.memory_space<smem>>
    %c0_i32_97 = arith.constant 0 : i32
    %178 = arith.maxsi %177, %c0_i32_97 : i32
    %c63_i32_98 = arith.constant 63 : i32
    %179 = arith.minsi %178, %c63_i32_98 : i32
    %180 = arith.index_cast %179 : i32 to index
    %c0_99 = arith.constant 0 : index
    %181 = vector.load %arg2[%180, %c0_99] : memref<64x32xf32, #tpu.memory_space<vmem>>, vector<1x32xf32>
    %182 = arith.index_cast %175 : i32 to index
    %c1_100 = arith.constant 1 : index
    %183 = memref.load %arg1[%182, %c1_100] : memref<8x8xi32, #tpu.memory_space<smem>>
    %c0_i32_101 = arith.constant 0 : i32
    %184 = arith.maxsi %183, %c0_i32_101 : i32
    %c63_i32_102 = arith.constant 63 : i32
    %185 = arith.minsi %184, %c63_i32_102 : i32
    %186 = arith.index_cast %185 : i32 to index
    %c0_103 = arith.constant 0 : index
    %187 = vector.load %arg2[%186, %c0_103] : memref<64x32xf32, #tpu.memory_space<vmem>>, vector<1x32xf32>
    %188 = arith.maximumf %181, %187 : vector<1x32xf32>
    %189 = arith.index_cast %175 : i32 to index
    %c2_104 = arith.constant 2 : index
    %190 = memref.load %arg1[%189, %c2_104] : memref<8x8xi32, #tpu.memory_space<smem>>
    %c0_i32_105 = arith.constant 0 : i32
    %191 = arith.maxsi %190, %c0_i32_105 : i32
    %c63_i32_106 = arith.constant 63 : i32
    %192 = arith.minsi %191, %c63_i32_106 : i32
    %193 = arith.index_cast %192 : i32 to index
    %c0_107 = arith.constant 0 : index
    %194 = vector.load %arg2[%193, %c0_107] : memref<64x32xf32, #tpu.memory_space<vmem>>, vector<1x32xf32>
    %195 = arith.maximumf %188, %194 : vector<1x32xf32>
    %196 = arith.index_cast %175 : i32 to index
    %c3_108 = arith.constant 3 : index
    %197 = memref.load %arg1[%196, %c3_108] : memref<8x8xi32, #tpu.memory_space<smem>>
    %c0_i32_109 = arith.constant 0 : i32
    %198 = arith.maxsi %197, %c0_i32_109 : i32
    %c63_i32_110 = arith.constant 63 : i32
    %199 = arith.minsi %198, %c63_i32_110 : i32
    %200 = arith.index_cast %199 : i32 to index
    %c0_111 = arith.constant 0 : index
    %201 = vector.load %arg2[%200, %c0_111] : memref<64x32xf32, #tpu.memory_space<vmem>>, vector<1x32xf32>
    %202 = arith.maximumf %195, %201 : vector<1x32xf32>
    %203 = arith.index_cast %175 : i32 to index
    %c4_112 = arith.constant 4 : index
    %204 = memref.load %arg1[%203, %c4_112] : memref<8x8xi32, #tpu.memory_space<smem>>
    %c0_i32_113 = arith.constant 0 : i32
    %205 = arith.maxsi %204, %c0_i32_113 : i32
    %c63_i32_114 = arith.constant 63 : i32
    %206 = arith.minsi %205, %c63_i32_114 : i32
    %207 = arith.index_cast %206 : i32 to index
    %c0_115 = arith.constant 0 : index
    %208 = vector.load %arg2[%207, %c0_115] : memref<64x32xf32, #tpu.memory_space<vmem>>, vector<1x32xf32>
    %209 = arith.maximumf %202, %208 : vector<1x32xf32>
    %210 = arith.index_cast %175 : i32 to index
    %c5_116 = arith.constant 5 : index
    %211 = memref.load %arg1[%210, %c5_116] : memref<8x8xi32, #tpu.memory_space<smem>>
    %c0_i32_117 = arith.constant 0 : i32
    %212 = arith.maxsi %211, %c0_i32_117 : i32
    %c63_i32_118 = arith.constant 63 : i32
    %213 = arith.minsi %212, %c63_i32_118 : i32
    %214 = arith.index_cast %213 : i32 to index
    %c0_119 = arith.constant 0 : index
    %215 = vector.load %arg2[%214, %c0_119] : memref<64x32xf32, #tpu.memory_space<vmem>>, vector<1x32xf32>
    %216 = arith.maximumf %209, %215 : vector<1x32xf32>
    %217 = arith.index_cast %175 : i32 to index
    %c6_120 = arith.constant 6 : index
    %218 = memref.load %arg1[%217, %c6_120] : memref<8x8xi32, #tpu.memory_space<smem>>
    %c0_i32_121 = arith.constant 0 : i32
    %219 = arith.maxsi %218, %c0_i32_121 : i32
    %c63_i32_122 = arith.constant 63 : i32
    %220 = arith.minsi %219, %c63_i32_122 : i32
    %221 = arith.index_cast %220 : i32 to index
    %c0_123 = arith.constant 0 : index
    %222 = vector.load %arg2[%221, %c0_123] : memref<64x32xf32, #tpu.memory_space<vmem>>, vector<1x32xf32>
    %223 = arith.maximumf %216, %222 : vector<1x32xf32>
    %224 = arith.index_cast %175 : i32 to index
    %c7_124 = arith.constant 7 : index
    %225 = memref.load %arg1[%224, %c7_124] : memref<8x8xi32, #tpu.memory_space<smem>>
    %c0_i32_125 = arith.constant 0 : i32
    %226 = arith.maxsi %225, %c0_i32_125 : i32
    %c63_i32_126 = arith.constant 63 : i32
    %227 = arith.minsi %226, %c63_i32_126 : i32
    %228 = arith.index_cast %227 : i32 to index
    %c0_127 = arith.constant 0 : index
    %229 = vector.load %arg2[%228, %c0_127] : memref<64x32xf32, #tpu.memory_space<vmem>>, vector<1x32xf32>
    %230 = arith.maximumf %223, %229 : vector<1x32xf32>
    %c3_128 = arith.constant 3 : index
    %c0_129 = arith.constant 0 : index
    %231 = vector.load %arg6[%c3_128, %c0_129] : memref<8x32xf32, #tpu.memory_space<vmem>>, vector<1x32xf32>
    tpu.vector_store %arg6[%c3_128, %c0_129], %230 {strides = array<i32>} : memref<8x32xf32, #tpu.memory_space<vmem>>, vector<1x32xf32>,
    %c8_i32_130 = arith.constant 8 : i32
    %232 = arith.muli %arg0, %c8_i32_130 : i32
    %c4_i32 = arith.constant 4 : i32
    %233 = arith.addi %232, %c4_i32 : i32
    %234 = arith.index_cast %233 : i32 to index
    %c0_131 = arith.constant 0 : index
    %235 = memref.load %arg1[%234, %c0_131] : memref<8x8xi32, #tpu.memory_space<smem>>
    %c0_i32_132 = arith.constant 0 : i32
    %236 = arith.maxsi %235, %c0_i32_132 : i32
    %c63_i32_133 = arith.constant 63 : i32
    %237 = arith.minsi %236, %c63_i32_133 : i32
    %238 = arith.index_cast %237 : i32 to index
    %c0_134 = arith.constant 0 : index
    %239 = vector.load %arg2[%238, %c0_134] : memref<64x32xf32, #tpu.memory_space<vmem>>, vector<1x32xf32>
    %240 = arith.index_cast %233 : i32 to index
    %c1_135 = arith.constant 1 : index
    %241 = memref.load %arg1[%240, %c1_135] : memref<8x8xi32, #tpu.memory_space<smem>>
    %c0_i32_136 = arith.constant 0 : i32
    %242 = arith.maxsi %241, %c0_i32_136 : i32
    %c63_i32_137 = arith.constant 63 : i32
    %243 = arith.minsi %242, %c63_i32_137 : i32
    %244 = arith.index_cast %243 : i32 to index
    %c0_138 = arith.constant 0 : index
    %245 = vector.load %arg2[%244, %c0_138] : memref<64x32xf32, #tpu.memory_space<vmem>>, vector<1x32xf32>
    %246 = arith.maximumf %239, %245 : vector<1x32xf32>
    %247 = arith.index_cast %233 : i32 to index
    %c2_139 = arith.constant 2 : index
    %248 = memref.load %arg1[%247, %c2_139] : memref<8x8xi32, #tpu.memory_space<smem>>
    %c0_i32_140 = arith.constant 0 : i32
    %249 = arith.maxsi %248, %c0_i32_140 : i32
    %c63_i32_141 = arith.constant 63 : i32
    %250 = arith.minsi %249, %c63_i32_141 : i32
    %251 = arith.index_cast %250 : i32 to index
    %c0_142 = arith.constant 0 : index
    %252 = vector.load %arg2[%251, %c0_142] : memref<64x32xf32, #tpu.memory_space<vmem>>, vector<1x32xf32>
    %253 = arith.maximumf %246, %252 : vector<1x32xf32>
    %254 = arith.index_cast %233 : i32 to index
    %c3_143 = arith.constant 3 : index
    %255 = memref.load %arg1[%254, %c3_143] : memref<8x8xi32, #tpu.memory_space<smem>>
    %c0_i32_144 = arith.constant 0 : i32
    %256 = arith.maxsi %255, %c0_i32_144 : i32
    %c63_i32_145 = arith.constant 63 : i32
    %257 = arith.minsi %256, %c63_i32_145 : i32
    %258 = arith.index_cast %257 : i32 to index
    %c0_146 = arith.constant 0 : index
    %259 = vector.load %arg2[%258, %c0_146] : memref<64x32xf32, #tpu.memory_space<vmem>>, vector<1x32xf32>
    %260 = arith.maximumf %253, %259 : vector<1x32xf32>
    %261 = arith.index_cast %233 : i32 to index
    %c4_147 = arith.constant 4 : index
    %262 = memref.load %arg1[%261, %c4_147] : memref<8x8xi32, #tpu.memory_space<smem>>
    %c0_i32_148 = arith.constant 0 : i32
    %263 = arith.maxsi %262, %c0_i32_148 : i32
    %c63_i32_149 = arith.constant 63 : i32
    %264 = arith.minsi %263, %c63_i32_149 : i32
    %265 = arith.index_cast %264 : i32 to index
    %c0_150 = arith.constant 0 : index
    %266 = vector.load %arg2[%265, %c0_150] : memref<64x32xf32, #tpu.memory_space<vmem>>, vector<1x32xf32>
    %267 = arith.maximumf %260, %266 : vector<1x32xf32>
    %268 = arith.index_cast %233 : i32 to index
    %c5_151 = arith.constant 5 : index
    %269 = memref.load %arg1[%268, %c5_151] : memref<8x8xi32, #tpu.memory_space<smem>>
    %c0_i32_152 = arith.constant 0 : i32
    %270 = arith.maxsi %269, %c0_i32_152 : i32
    %c63_i32_153 = arith.constant 63 : i32
    %271 = arith.minsi %270, %c63_i32_153 : i32
    %272 = arith.index_cast %271 : i32 to index
    %c0_154 = arith.constant 0 : index
    %273 = vector.load %arg2[%272, %c0_154] : memref<64x32xf32, #tpu.memory_space<vmem>>, vector<1x32xf32>
    %274 = arith.maximumf %267, %273 : vector<1x32xf32>
    %275 = arith.index_cast %233 : i32 to index
    %c6_155 = arith.constant 6 : index
    %276 = memref.load %arg1[%275, %c6_155] : memref<8x8xi32, #tpu.memory_space<smem>>
    %c0_i32_156 = arith.constant 0 : i32
    %277 = arith.maxsi %276, %c0_i32_156 : i32
    %c63_i32_157 = arith.constant 63 : i32
    %278 = arith.minsi %277, %c63_i32_157 : i32
    %279 = arith.index_cast %278 : i32 to index
    %c0_158 = arith.constant 0 : index
    %280 = vector.load %arg2[%279, %c0_158] : memref<64x32xf32, #tpu.memory_space<vmem>>, vector<1x32xf32>
    %281 = arith.maximumf %274, %280 : vector<1x32xf32>
    %282 = arith.index_cast %233 : i32 to index
    %c7_159 = arith.constant 7 : index
    %283 = memref.load %arg1[%282, %c7_159] : memref<8x8xi32, #tpu.memory_space<smem>>
    %c0_i32_160 = arith.constant 0 : i32
    %284 = arith.maxsi %283, %c0_i32_160 : i32
    %c63_i32_161 = arith.constant 63 : i32
    %285 = arith.minsi %284, %c63_i32_161 : i32
    %286 = arith.index_cast %285 : i32 to index
    %c0_162 = arith.constant 0 : index
    %287 = vector.load %arg2[%286, %c0_162] : memref<64x32xf32, #tpu.memory_space<vmem>>, vector<1x32xf32>
    %288 = arith.maximumf %281, %287 : vector<1x32xf32>
    %c4_163 = arith.constant 4 : index
    %c0_164 = arith.constant 0 : index
    %289 = vector.load %arg6[%c4_163, %c0_164] : memref<8x32xf32, #tpu.memory_space<vmem>>, vector<1x32xf32>
    tpu.vector_store %arg6[%c4_163, %c0_164], %288 {strides = array<i32>} : memref<8x32xf32, #tpu.memory_space<vmem>>, vector<1x32xf32>,
    %c8_i32_165 = arith.constant 8 : i32
    %290 = arith.muli %arg0, %c8_i32_165 : i32
    %c5_i32 = arith.constant 5 : i32
    %291 = arith.addi %290, %c5_i32 : i32
    %292 = arith.index_cast %291 : i32 to index
    %c0_166 = arith.constant 0 : index
    %293 = memref.load %arg1[%292, %c0_166] : memref<8x8xi32, #tpu.memory_space<smem>>
    %c0_i32_167 = arith.constant 0 : i32
    %294 = arith.maxsi %293, %c0_i32_167 : i32
    %c63_i32_168 = arith.constant 63 : i32
    %295 = arith.minsi %294, %c63_i32_168 : i32
    %296 = arith.index_cast %295 : i32 to index
    %c0_169 = arith.constant 0 : index
    %297 = vector.load %arg2[%296, %c0_169] : memref<64x32xf32, #tpu.memory_space<vmem>>, vector<1x32xf32>
    %298 = arith.index_cast %291 : i32 to index
    %c1_170 = arith.constant 1 : index
    %299 = memref.load %arg1[%298, %c1_170] : memref<8x8xi32, #tpu.memory_space<smem>>
    %c0_i32_171 = arith.constant 0 : i32
    %300 = arith.maxsi %299, %c0_i32_171 : i32
    %c63_i32_172 = arith.constant 63 : i32
    %301 = arith.minsi %300, %c63_i32_172 : i32
    %302 = arith.index_cast %301 : i32 to index
    %c0_173 = arith.constant 0 : index
    %303 = vector.load %arg2[%302, %c0_173] : memref<64x32xf32, #tpu.memory_space<vmem>>, vector<1x32xf32>
    %304 = arith.maximumf %297, %303 : vector<1x32xf32>
    %305 = arith.index_cast %291 : i32 to index
    %c2_174 = arith.constant 2 : index
    %306 = memref.load %arg1[%305, %c2_174] : memref<8x8xi32, #tpu.memory_space<smem>>
    %c0_i32_175 = arith.constant 0 : i32
    %307 = arith.maxsi %306, %c0_i32_175 : i32
    %c63_i32_176 = arith.constant 63 : i32
    %308 = arith.minsi %307, %c63_i32_176 : i32
    %309 = arith.index_cast %308 : i32 to index
    %c0_177 = arith.constant 0 : index
    %310 = vector.load %arg2[%309, %c0_177] : memref<64x32xf32, #tpu.memory_space<vmem>>, vector<1x32xf32>
    %311 = arith.maximumf %304, %310 : vector<1x32xf32>
    %312 = arith.index_cast %291 : i32 to index
    %c3_178 = arith.constant 3 : index
    %313 = memref.load %arg1[%312, %c3_178] : memref<8x8xi32, #tpu.memory_space<smem>>
    %c0_i32_179 = arith.constant 0 : i32
    %314 = arith.maxsi %313, %c0_i32_179 : i32
    %c63_i32_180 = arith.constant 63 : i32
    %315 = arith.minsi %314, %c63_i32_180 : i32
    %316 = arith.index_cast %315 : i32 to index
    %c0_181 = arith.constant 0 : index
    %317 = vector.load %arg2[%316, %c0_181] : memref<64x32xf32, #tpu.memory_space<vmem>>, vector<1x32xf32>
    %318 = arith.maximumf %311, %317 : vector<1x32xf32>
    %319 = arith.index_cast %291 : i32 to index
    %c4_182 = arith.constant 4 : index
    %320 = memref.load %arg1[%319, %c4_182] : memref<8x8xi32, #tpu.memory_space<smem>>
    %c0_i32_183 = arith.constant 0 : i32
    %321 = arith.maxsi %320, %c0_i32_183 : i32
    %c63_i32_184 = arith.constant 63 : i32
    %322 = arith.minsi %321, %c63_i32_184 : i32
    %323 = arith.index_cast %322 : i32 to index
    %c0_185 = arith.constant 0 : index
    %324 = vector.load %arg2[%323, %c0_185] : memref<64x32xf32, #tpu.memory_space<vmem>>, vector<1x32xf32>
    %325 = arith.maximumf %318, %324 : vector<1x32xf32>
    %326 = arith.index_cast %291 : i32 to index
    %c5_186 = arith.constant 5 : index
    %327 = memref.load %arg1[%326, %c5_186] : memref<8x8xi32, #tpu.memory_space<smem>>
    %c0_i32_187 = arith.constant 0 : i32
    %328 = arith.maxsi %327, %c0_i32_187 : i32
    %c63_i32_188 = arith.constant 63 : i32
    %329 = arith.minsi %328, %c63_i32_188 : i32
    %330 = arith.index_cast %329 : i32 to index
    %c0_189 = arith.constant 0 : index
    %331 = vector.load %arg2[%330, %c0_189] : memref<64x32xf32, #tpu.memory_space<vmem>>, vector<1x32xf32>
    %332 = arith.maximumf %325, %331 : vector<1x32xf32>
    %333 = arith.index_cast %291 : i32 to index
    %c6_190 = arith.constant 6 : index
    %334 = memref.load %arg1[%333, %c6_190] : memref<8x8xi32, #tpu.memory_space<smem>>
    %c0_i32_191 = arith.constant 0 : i32
    %335 = arith.maxsi %334, %c0_i32_191 : i32
    %c63_i32_192 = arith.constant 63 : i32
    %336 = arith.minsi %335, %c63_i32_192 : i32
    %337 = arith.index_cast %336 : i32 to index
    %c0_193 = arith.constant 0 : index
    %338 = vector.load %arg2[%337, %c0_193] : memref<64x32xf32, #tpu.memory_space<vmem>>, vector<1x32xf32>
    %339 = arith.maximumf %332, %338 : vector<1x32xf32>
    %340 = arith.index_cast %291 : i32 to index
    %c7_194 = arith.constant 7 : index
    %341 = memref.load %arg1[%340, %c7_194] : memref<8x8xi32, #tpu.memory_space<smem>>
    %c0_i32_195 = arith.constant 0 : i32
    %342 = arith.maxsi %341, %c0_i32_195 : i32
    %c63_i32_196 = arith.constant 63 : i32
    %343 = arith.minsi %342, %c63_i32_196 : i32
    %344 = arith.index_cast %343 : i32 to index
    %c0_197 = arith.constant 0 : index
    %345 = vector.load %arg2[%344, %c0_197] : memref<64x32xf32, #tpu.memory_space<vmem>>, vector<1x32xf32>
    %346 = arith.maximumf %339, %345 : vector<1x32xf32>
    %c5_198 = arith.constant 5 : index
    %c0_199 = arith.constant 0 : index
    %347 = vector.load %arg6[%c5_198, %c0_199] : memref<8x32xf32, #tpu.memory_space<vmem>>, vector<1x32xf32>
    tpu.vector_store %arg6[%c5_198, %c0_199], %346 {strides = array<i32>} : memref<8x32xf32, #tpu.memory_space<vmem>>, vector<1x32xf32>,
    %c8_i32_200 = arith.constant 8 : i32
    %348 = arith.muli %arg0, %c8_i32_200 : i32
    %c6_i32 = arith.constant 6 : i32
    %349 = arith.addi %348, %c6_i32 : i32
    %350 = arith.index_cast %349 : i32 to index
    %c0_201 = arith.constant 0 : index
    %351 = memref.load %arg1[%350, %c0_201] : memref<8x8xi32, #tpu.memory_space<smem>>
    %c0_i32_202 = arith.constant 0 : i32
    %352 = arith.maxsi %351, %c0_i32_202 : i32
    %c63_i32_203 = arith.constant 63 : i32
    %353 = arith.minsi %352, %c63_i32_203 : i32
    %354 = arith.index_cast %353 : i32 to index
    %c0_204 = arith.constant 0 : index
    %355 = vector.load %arg2[%354, %c0_204] : memref<64x32xf32, #tpu.memory_space<vmem>>, vector<1x32xf32>
    %356 = arith.index_cast %349 : i32 to index
    %c1_205 = arith.constant 1 : index
    %357 = memref.load %arg1[%356, %c1_205] : memref<8x8xi32, #tpu.memory_space<smem>>
    %c0_i32_206 = arith.constant 0 : i32
    %358 = arith.maxsi %357, %c0_i32_206 : i32
    %c63_i32_207 = arith.constant 63 : i32
    %359 = arith.minsi %358, %c63_i32_207 : i32
    %360 = arith.index_cast %359 : i32 to index
    %c0_208 = arith.constant 0 : index
    %361 = vector.load %arg2[%360, %c0_208] : memref<64x32xf32, #tpu.memory_space<vmem>>, vector<1x32xf32>
    %362 = arith.maximumf %355, %361 : vector<1x32xf32>
    %363 = arith.index_cast %349 : i32 to index
    %c2_209 = arith.constant 2 : index
    %364 = memref.load %arg1[%363, %c2_209] : memref<8x8xi32, #tpu.memory_space<smem>>
    %c0_i32_210 = arith.constant 0 : i32
    %365 = arith.maxsi %364, %c0_i32_210 : i32
    %c63_i32_211 = arith.constant 63 : i32
    %366 = arith.minsi %365, %c63_i32_211 : i32
    %367 = arith.index_cast %366 : i32 to index
    %c0_212 = arith.constant 0 : index
    %368 = vector.load %arg2[%367, %c0_212] : memref<64x32xf32, #tpu.memory_space<vmem>>, vector<1x32xf32>
    %369 = arith.maximumf %362, %368 : vector<1x32xf32>
    %370 = arith.index_cast %349 : i32 to index
    %c3_213 = arith.constant 3 : index
    %371 = memref.load %arg1[%370, %c3_213] : memref<8x8xi32, #tpu.memory_space<smem>>
    %c0_i32_214 = arith.constant 0 : i32
    %372 = arith.maxsi %371, %c0_i32_214 : i32
    %c63_i32_215 = arith.constant 63 : i32
    %373 = arith.minsi %372, %c63_i32_215 : i32
    %374 = arith.index_cast %373 : i32 to index
    %c0_216 = arith.constant 0 : index
    %375 = vector.load %arg2[%374, %c0_216] : memref<64x32xf32, #tpu.memory_space<vmem>>, vector<1x32xf32>
    %376 = arith.maximumf %369, %375 : vector<1x32xf32>
    %377 = arith.index_cast %349 : i32 to index
    %c4_217 = arith.constant 4 : index
    %378 = memref.load %arg1[%377, %c4_217] : memref<8x8xi32, #tpu.memory_space<smem>>
    %c0_i32_218 = arith.constant 0 : i32
    %379 = arith.maxsi %378, %c0_i32_218 : i32
    %c63_i32_219 = arith.constant 63 : i32
    %380 = arith.minsi %379, %c63_i32_219 : i32
    %381 = arith.index_cast %380 : i32 to index
    %c0_220 = arith.constant 0 : index
    %382 = vector.load %arg2[%381, %c0_220] : memref<64x32xf32, #tpu.memory_space<vmem>>, vector<1x32xf32>
    %383 = arith.maximumf %376, %382 : vector<1x32xf32>
    %384 = arith.index_cast %349 : i32 to index
    %c5_221 = arith.constant 5 : index
    %385 = memref.load %arg1[%384, %c5_221] : memref<8x8xi32, #tpu.memory_space<smem>>
    %c0_i32_222 = arith.constant 0 : i32
    %386 = arith.maxsi %385, %c0_i32_222 : i32
    %c63_i32_223 = arith.constant 63 : i32
    %387 = arith.minsi %386, %c63_i32_223 : i32
    %388 = arith.index_cast %387 : i32 to index
    %c0_224 = arith.constant 0 : index
    %389 = vector.load %arg2[%388, %c0_224] : memref<64x32xf32, #tpu.memory_space<vmem>>, vector<1x32xf32>
    %390 = arith.maximumf %383, %389 : vector<1x32xf32>
    %391 = arith.index_cast %349 : i32 to index
    %c6_225 = arith.constant 6 : index
    %392 = memref.load %arg1[%391, %c6_225] : memref<8x8xi32, #tpu.memory_space<smem>>
    %c0_i32_226 = arith.constant 0 : i32
    %393 = arith.maxsi %392, %c0_i32_226 : i32
    %c63_i32_227 = arith.constant 63 : i32
    %394 = arith.minsi %393, %c63_i32_227 : i32
    %395 = arith.index_cast %394 : i32 to index
    %c0_228 = arith.constant 0 : index
    %396 = vector.load %arg2[%395, %c0_228] : memref<64x32xf32, #tpu.memory_space<vmem>>, vector<1x32xf32>
    %397 = arith.maximumf %390, %396 : vector<1x32xf32>
    %398 = arith.index_cast %349 : i32 to index
    %c7_229 = arith.constant 7 : index
    %399 = memref.load %arg1[%398, %c7_229] : memref<8x8xi32, #tpu.memory_space<smem>>
    %c0_i32_230 = arith.constant 0 : i32
    %400 = arith.maxsi %399, %c0_i32_230 : i32
    %c63_i32_231 = arith.constant 63 : i32
    %401 = arith.minsi %400, %c63_i32_231 : i32
    %402 = arith.index_cast %401 : i32 to index
    %c0_232 = arith.constant 0 : index
    %403 = vector.load %arg2[%402, %c0_232] : memref<64x32xf32, #tpu.memory_space<vmem>>, vector<1x32xf32>
    %404 = arith.maximumf %397, %403 : vector<1x32xf32>
    %c6_233 = arith.constant 6 : index
    %c0_234 = arith.constant 0 : index
    %405 = vector.load %arg6[%c6_233, %c0_234] : memref<8x32xf32, #tpu.memory_space<vmem>>, vector<1x32xf32>
    tpu.vector_store %arg6[%c6_233, %c0_234], %404 {strides = array<i32>} : memref<8x32xf32, #tpu.memory_space<vmem>>, vector<1x32xf32>,
    %c8_i32_235 = arith.constant 8 : i32
    %406 = arith.muli %arg0, %c8_i32_235 : i32
    %c7_i32 = arith.constant 7 : i32
    %407 = arith.addi %406, %c7_i32 : i32
    %408 = arith.index_cast %407 : i32 to index
    %c0_236 = arith.constant 0 : index
    %409 = memref.load %arg1[%408, %c0_236] : memref<8x8xi32, #tpu.memory_space<smem>>
    %c0_i32_237 = arith.constant 0 : i32
    %410 = arith.maxsi %409, %c0_i32_237 : i32
    %c63_i32_238 = arith.constant 63 : i32
    %411 = arith.minsi %410, %c63_i32_238 : i32
    %412 = arith.index_cast %411 : i32 to index
    %c0_239 = arith.constant 0 : index
    %413 = vector.load %arg2[%412, %c0_239] : memref<64x32xf32, #tpu.memory_space<vmem>>, vector<1x32xf32>
    %414 = arith.index_cast %407 : i32 to index
    %c1_240 = arith.constant 1 : index
    %415 = memref.load %arg1[%414, %c1_240] : memref<8x8xi32, #tpu.memory_space<smem>>
    %c0_i32_241 = arith.constant 0 : i32
    %416 = arith.maxsi %415, %c0_i32_241 : i32
    %c63_i32_242 = arith.constant 63 : i32
    %417 = arith.minsi %416, %c63_i32_242 : i32
    %418 = arith.index_cast %417 : i32 to index
    %c0_243 = arith.constant 0 : index
    %419 = vector.load %arg2[%418, %c0_243] : memref<64x32xf32, #tpu.memory_space<vmem>>, vector<1x32xf32>
    %420 = arith.maximumf %413, %419 : vector<1x32xf32>
    %421 = arith.index_cast %407 : i32 to index
    %c2_244 = arith.constant 2 : index
    %422 = memref.load %arg1[%421, %c2_244] : memref<8x8xi32, #tpu.memory_space<smem>>
    %c0_i32_245 = arith.constant 0 : i32
    %423 = arith.maxsi %422, %c0_i32_245 : i32
    %c63_i32_246 = arith.constant 63 : i32
    %424 = arith.minsi %423, %c63_i32_246 : i32
    %425 = arith.index_cast %424 : i32 to index
    %c0_247 = arith.constant 0 : index
    %426 = vector.load %arg2[%425, %c0_247] : memref<64x32xf32, #tpu.memory_space<vmem>>, vector<1x32xf32>
    %427 = arith.maximumf %420, %426 : vector<1x32xf32>
    %428 = arith.index_cast %407 : i32 to index
    %c3_248 = arith.constant 3 : index
    %429 = memref.load %arg1[%428, %c3_248] : memref<8x8xi32, #tpu.memory_space<smem>>
    %c0_i32_249 = arith.constant 0 : i32
    %430 = arith.maxsi %429, %c0_i32_249 : i32
    %c63_i32_250 = arith.constant 63 : i32
    %431 = arith.minsi %430, %c63_i32_250 : i32
    %432 = arith.index_cast %431 : i32 to index
    %c0_251 = arith.constant 0 : index
    %433 = vector.load %arg2[%432, %c0_251] : memref<64x32xf32, #tpu.memory_space<vmem>>, vector<1x32xf32>
    %434 = arith.maximumf %427, %433 : vector<1x32xf32>
    %435 = arith.index_cast %407 : i32 to index
    %c4_252 = arith.constant 4 : index
    %436 = memref.load %arg1[%435, %c4_252] : memref<8x8xi32, #tpu.memory_space<smem>>
    %c0_i32_253 = arith.constant 0 : i32
    %437 = arith.maxsi %436, %c0_i32_253 : i32
    %c63_i32_254 = arith.constant 63 : i32
    %438 = arith.minsi %437, %c63_i32_254 : i32
    %439 = arith.index_cast %438 : i32 to index
    %c0_255 = arith.constant 0 : index
    %440 = vector.load %arg2[%439, %c0_255] : memref<64x32xf32, #tpu.memory_space<vmem>>, vector<1x32xf32>
    %441 = arith.maximumf %434, %440 : vector<1x32xf32>
    %442 = arith.index_cast %407 : i32 to index
    %c5_256 = arith.constant 5 : index
    %443 = memref.load %arg1[%442, %c5_256] : memref<8x8xi32, #tpu.memory_space<smem>>
    %c0_i32_257 = arith.constant 0 : i32
    %444 = arith.maxsi %443, %c0_i32_257 : i32
    %c63_i32_258 = arith.constant 63 : i32
    %445 = arith.minsi %444, %c63_i32_258 : i32
    %446 = arith.index_cast %445 : i32 to index
    %c0_259 = arith.constant 0 : index
    %447 = vector.load %arg2[%446, %c0_259] : memref<64x32xf32, #tpu.memory_space<vmem>>, vector<1x32xf32>
    %448 = arith.maximumf %441, %447 : vector<1x32xf32>
    %449 = arith.index_cast %407 : i32 to index
    %c6_260 = arith.constant 6 : index
    %450 = memref.load %arg1[%449, %c6_260] : memref<8x8xi32, #tpu.memory_space<smem>>
    %c0_i32_261 = arith.constant 0 : i32
    %451 = arith.maxsi %450, %c0_i32_261 : i32
    %c63_i32_262 = arith.constant 63 : i32
    %452 = arith.minsi %451, %c63_i32_262 : i32
    %453 = arith.index_cast %452 : i32 to index
    %c0_263 = arith.constant 0 : index
    %454 = vector.load %arg2[%453, %c0_263] : memref<64x32xf32, #tpu.memory_space<vmem>>, vector<1x32xf32>
    %455 = arith.maximumf %448, %454 : vector<1x32xf32>
    %456 = arith.index_cast %407 : i32 to index
    %c7_264 = arith.constant 7 : index
    %457 = memref.load %arg1[%456, %c7_264] : memref<8x8xi32, #tpu.memory_space<smem>>
    %c0_i32_265 = arith.constant 0 : i32
    %458 = arith.maxsi %457, %c0_i32_265 : i32
    %c63_i32_266 = arith.constant 63 : i32
    %459 = arith.minsi %458, %c63_i32_266 : i32
    %460 = arith.index_cast %459 : i32 to index
    %c0_267 = arith.constant 0 : index
    %461 = vector.load %arg2[%460, %c0_267] : memref<64x32xf32, #tpu.memory_space<vmem>>, vector<1x32xf32>
    %462 = arith.maximumf %455, %461 : vector<1x32xf32>
    %c7_268 = arith.constant 7 : index
    %c0_269 = arith.constant 0 : index
    %463 = vector.load %arg6[%c7_268, %c0_269] : memref<8x32xf32, #tpu.memory_space<vmem>>, vector<1x32xf32>
    tpu.vector_store %arg6[%c7_268, %c0_269], %462 {strides = array<i32>} : memref<8x32xf32, #tpu.memory_space<vmem>>, vector<1x32xf32>,
    %c0_270 = arith.constant 0 : index
    %c0_271 = arith.constant 0 : index
    %464 = vector.load %arg6[%c0_270, %c0_271] : memref<8x32xf32, #tpu.memory_space<vmem>>, vector<8x32xf32>
    %c0_272 = arith.constant 0 : index
    %c0_273 = arith.constant 0 : index
    %465 = vector.load %arg3[%c0_272, %c0_273] : memref<32x128xf32, #tpu.memory_space<vmem>>, vector<32x128xf32>
    %cst = arith.constant dense<0.000000e+00> : vector<8x128xf32>
    %466 = tpu.matmul %464, %465, %cst {dimension_numbers = #tpu.dot_dimension_numbers<[1], [0], [0], [1], [0, 0, 1, 1], [], []>} : vector<8x32xf32>, vector<32x128xf32>, vector<8x128xf32> -> vector<8x128xf32>
    %c0_274 = arith.constant 0 : index
    %c0_275 = arith.constant 0 : index
    %467 = vector.load %arg4[%c0_274, %c0_275] : memref<1x128xf32, #tpu.memory_space<vmem>>, vector<1x128xf32>
    %468 = vector.broadcast %467 : vector<1x128xf32> to vector<8x128xf32>
    %469 = arith.addf %466, %468 : vector<8x128xf32>
    %c0_276 = arith.constant 0 : index
    %c0_277 = arith.constant 0 : index
    %470 = vector.load %arg5[%c0_276, %c0_277] : memref<8x128xf32, #tpu.memory_space<vmem>>, vector<8x128xf32>
    tpu.vector_store %arg5[%c0_276, %c0_277], %469 {strides = array<i32>} : memref<8x128xf32, #tpu.memory_space<vmem>>, vector<8x128xf32>,
    return
  }
  func.func @transform_0(%arg0: i32, %arg1: memref<8x8xi32, #tpu.memory_space<smem>>) -> (i32, i32) {
    %c0_i32 = arith.constant 0 : i32
    %c0_i32_0 = arith.constant 0 : i32
    %c0_i32_1 = arith.constant 0 : i32
    return %c0_i32, %c0_i32_0 : i32, i32
  }
  func.func @transform_1(%arg0: i32, %arg1: memref<8x8xi32, #tpu.memory_space<smem>>) -> (i32, i32) {
    %c0_i32 = arith.constant 0 : i32
    %c0_i32_0 = arith.constant 0 : i32
    %c0_i32_1 = arith.constant 0 : i32
    return %c0_i32, %c0_i32_0 : i32, i32
  }
  func.func @transform_2(%arg0: i32, %arg1: memref<8x8xi32, #tpu.memory_space<smem>>) -> (i32, i32) {
    %c0_i32 = arith.constant 0 : i32
    %c0_i32_0 = arith.constant 0 : i32
    %c0_i32_1 = arith.constant 0 : i32
    return %c0_i32, %c0_i32_0 : i32, i32
  }
  func.func @transform_3(%arg0: i32, %arg1: memref<8x8xi32, #tpu.memory_space<smem>>) -> (i32, i32) {
    %c0_i32 = arith.constant 0 : i32
    %c0_i32_0 = arith.constant 0 : i32
    return %arg0, %c0_i32 : i32, i32
  }
}

</mosaic_0001>

<bundles_post_ra>
// kernel: baseline_forward.1
= control target key start
LH: loop header
LB: loop body
LE: loop exit
PB: predicated region body
PF: predicated region fallthrough
CT: control target
= control target key end

     0   :  { %s1809_s0 = inlined_call_operand.vmem [shape: s32[8,8], index: 0, kind: input, shape index: {}]   ;;  %s1810_s1 = inlined_call_operand.vmem [shape: f32[64,32], index: 1, kind: input, shape index: {}]   ;;  %s1811_s2 = inlined_call_operand.vmem [shape: f32[32,128], index: 2, kind: input, shape index: {}]   ;;  %s1812_s3 = inlined_call_operand.vmem [shape: f32[1,128], index: 3, kind: input, shape index: {}]   ;;  %s1813_s4 = inlined_call_operand.vmem [shape: f32[8,128], index: 4, kind: output, shape index: {}]  }
   0x1   :  { %s9_s17 = sshll.u32 %s1809_s0, 4  ;;  %s10_s17 = int_to_ptr.vmem [resolvable:$true] %s9_s17 }
   0x2   :  { %s1300_s18 = scalar_lea.vmem %s10_s17, 128  ;;  %p1305_p1 = scmp.lt.s32.totalorder %s10_s17, %s10_s17 }
   0x3   :  { %p1301_p0 = scmp.ne.s32.totalorder %s10_s17, %s1300_s18  ;;  %p1306_p2 = scmp.lt.s32.totalorder %s1300_s18, %s1300_s18 }
   0x5   :  { %p1307_p3 = por %p1306_p2, %p1305_p1 }
   0x7   :  { %p1308_p4 = pnand %p1307_p3, %p1301_p0 }
   0x9   :  { %1311 = shalt.err (!%p1308_p4)  }
   0xa   :  { %s1314_s19 = smov [#allocation4]  }
   0xb   :  { %12 = dma.vmem_to_smem %s10_s17, 128, %s1314_s19, [#allocation3] }
   0xc   :  { %1312 = dma.done.wait [#allocation3], 128 }
   0xd   :  { %1313 = vsyncadd [#allocation3], 4294967168 }
   0xe   :  { %14 = sfence }
   0xf   :  { %s23_s20 = sld [smem:[#allocation4]]  ;;  %s766_s21 = sld [smem:[#allocation4 + $0x1]]  ;;  %vm93_vm0 = vcmask 253952   ;;  %v607_v60 = vld [vmem:[%s1811_s2] sm:$0xff]  ;;  %v608_v61 = vld [vmem:[%s1811_s2 + $0x8] sm:$0xff]  ;;  %v1315_v63 = vmov 0.0|0.0  }
  0x10   :  { %s772_s22 = sld [smem:[#allocation4 + $0x2]]  ;;  %s1346_s23 = sld [smem:[#allocation4 + $0x3]]  ;;  %v1291_v62 = vpack.c.bf16 %v608_v61, %v607_v60  ;;  %1290 = vmatprep.subr.bf16.mxu0 %v1315_v63  ;;  %vm1316_vm1 = vmmov 0   ;;  %vm618_vm2 = vcmask 261120  }
  0x11   :  { %s1348_s24 = sld [smem:[#allocation4 + $0x4]]  ;;  %s1350_s0 = sld [smem:[#allocation4 + $0x5]] }
  0x12   :  { %s1352_s25 = sld [smem:[#allocation4 + $0x6]]  ;;  %s1354_s26 = sld [smem:[#allocation4 + $0x7]]  ;;  %1292 = vmatpush3.bf16.msra.mxu0 %v1291_v62 }
  0x13   :  { %s1356_s27 = sld [smem:[#allocation4 + $0x80]]  ;;  %s1358_s28 = sld [smem:[#allocation4 + $0x81]]  ;;  %1293 = vmatprep.subr.bf16.mxu0 %v1315_v63 }
  0x14   :  { %s1360_s29 = sld [smem:[#allocation4 + $0x82]]  ;;  %s1362_s30 = sld [smem:[#allocation4 + $0x83]] }
  0x15   :  { %p24_p5 = scmp.gt.s32.totalorder %s23_s20, 0  ;;  %p761_p6 = scmp.lt.s32.totalorder %s23_s20, 63 }
  0x16   :  { %p32_p7 = scmp.gt.s32.totalorder %s766_s21, 0  ;;  %p767_p8 = scmp.lt.s32.totalorder %s766_s21, 63 }
  0x17   :  { %s1815_s20 = smov (!%p24_p5, %s23_s20), 0  ;;  %p41_p9 = scmp.gt.s32.totalorder %s772_s22, 0 }
  0x18   :  { %s1817_s21 = smov (!%p32_p7, %s766_s21), 0  ;;  %s1819_s20 = smov (!%p761_p6, %s1815_s20), 63 }
  0x19   :  { %s1821_s21 = smov (!%p767_p8, %s1817_s21), 63  ;;  %s28_s7 = scalar_lea.vmem %s1810_s1, %s1819_s20 }
  0x1a   :  { %v29_v0 = vld [vmem:[%s28_s7] sm:$0x1]  ;;  %s36_s10 = scalar_lea.vmem %s1810_s1, %s1821_s21  ;;  %p773_p10 = scmp.lt.s32.totalorder %s772_s22, 63 }
  0x1b   :  { %v37_v1 = vld [vmem:[%s36_s10] sm:$0x1]  ;;  %s1823_s22 = smov (!%p41_p9, %s772_s22), 0  ;;  %p50_p11 = scmp.gt.s32.totalorder %s1346_s23, 0 }
  0x1c   :  { %p779_p12 = scmp.lt.s32.totalorder %s1346_s23, 63  ;;  %v38_v2 = vmax.f32 %v29_v0, %v37_v1  ;;  %s1825_s22 = smov (!%p773_p10, %s1823_s22), 63  ;;  %v609_v0 = vld [vmem:[%s1811_s2 + $0x10] sm:$0xff]  ;;  %v610_v1 = vld [vmem:[%s1811_s2 + $0x18] sm:$0xff] }
  0x1d   :  { %s1827_s23 = smov (!%p50_p11, %s1346_s23), 0  ;;  %s45_s13 = scalar_lea.vmem %s1810_s1, %s1825_s22 }
  0x1e   :  { %p59_p13 = scmp.gt.s32.totalorder %s1348_s24, 0  ;;  %v46_v3 = vld [vmem:[%s45_s13] sm:$0x1]  ;;  %s1829_s23 = smov (!%p779_p12, %s1827_s23), 63 }
  0x1f   :  { %v47_v4 = vmax.f32 %v38_v2, %v46_v3  ;;  %s54_s17 = scalar_lea.vmem %s1810_s1, %s1829_s23  ;;  %p785_p0 = scmp.lt.s32.totalorder %s1348_s24, 63  ;;  %v1294_v3 = vpack.c.bf16 %v610_v1, %v609_v0  ;;  %v1144_v1 = vld [vmem:[%s1812_s3] ss:$0 sm:$0xff] }
  0x20   :  { %s60_s14 = scalar_select %p59_p13, %s1348_s24, 0  ;;  %v55_v5 = vld [vmem:[%s54_s17] sm:$0x1] }
  0x21   :  { %p68_p1 = scmp.gt.s32.totalorder %s1350_s0, 0  ;;  %p791_p2 = scmp.lt.s32.totalorder %s1350_s0, 63  ;;  %v56_v6 = vmax.f32 %v47_v4, %v55_v5  ;;  %1295 = vmatpush3.bf16.msra.mxu0 %v1294_v3 }
  0x22   :  { %s1831_s14 = smov (!%p785_p0, %s60_s14), 63  ;;  %p77_p3 = scmp.gt.s32.totalorder %s1352_s25, 0 }
  0x23   :  { %s1833_s0 = smov (!%p68_p1, %s1350_s0), 0  ;;  %s63_s20 = scalar_lea.vmem %s1810_s1, %s1831_s14 }
  0x24   :  { %v64_v7 = vld [vmem:[%s63_s20] sm:$0x1]  ;;  %s1835_s0 = smov (!%p791_p2, %s1833_s0), 63  ;;  %p797_p4 = scmp.lt.s32.totalorder %s1352_s25, 63 }
  0x25   :  { %v65_v8 = vmax.f32 %v56_v6, %v64_v7  ;;  %s78_s21 = scalar_select %p77_p3, %s1352_s25, 0  ;;  %v1317_v6 = vmov 0.0  }
  0x26   :  { %s72_s24 = scalar_lea.vmem %s1810_s1, %s1835_s0  ;;  %p86_p5 = scmp.gt.s32.totalorder %s1354_s26, 0  ;;  %1287 = vmatprep.mubr.msk.f32.mxu0 %vm1316_vm1, %v1317_v6 }
  0x27   :  { %v73_v9 = vld [vmem:[%s72_s24] sm:$0x1]  ;;  %p803_p6 = scmp.lt.s32.totalorder %s1354_s26, 63  ;;  %s1837_s21 = smov (!%p797_p4, %s78_s21), 63 }
  0x28   :  { %v74_v10 = vmax.f32 %v65_v8, %v73_v9  ;;  %s1839_s26 = smov (!%p86_p5, %s1354_s26), 0  ;;  %s81_s7 = scalar_lea.vmem %s1810_s1, %s1837_s21 }
  0x29   :  { %p98_p7 = scmp.gt.s32.totalorder %s1356_s27, 0  ;;  %v82_v11 = vld [vmem:[%s81_s7] sm:$0x1]  ;;  %s1841_s26 = smov (!%p803_p6, %s1839_s26), 63 }
  0x2a   :  { %v83_v12 = vmax.f32 %v74_v10, %v82_v11  ;;  %s90_s9 = scalar_lea.vmem %s1810_s1, %s1841_s26  ;;  %p809_p8 = scmp.lt.s32.totalorder %s1356_s27, 63 }
  0x2b   :  { %s99_s0 = scalar_select %p98_p7, %s1356_s27, 0  ;;  %v91_v13 = vld [vmem:[%s90_s9] sm:$0x1] }
  0x2c   :  { %p106_p9 = scmp.gt.s32.totalorder %s1358_s28, 0  ;;  %p815_p10 = scmp.lt.s32.totalorder %s1358_s28, 63  ;;  %v92_v14 = vmax.f32 %v83_v12, %v91_v13 }
  0x2d   :  { %s1843_s0 = smov (!%p809_p8, %s99_s0), 63  ;;  %p115_p11 = scmp.gt.s32.totalorder %s1360_s29, 0 }
  0x2e   :  { %s1845_s28 = smov (!%p106_p9, %s1358_s28), 0  ;;  %94 = vst.msk [vmem:[#allocation2] sm:$0x1] %vm93_vm0, %v92_v14  ;;  %s102_s12 = scalar_lea.vmem %s1810_s1, %s1843_s0 }
  0x2f   :  { %s1847_s28 = smov (!%p815_p10, %s1845_s28), 63  ;;  %p821_p12 = scmp.lt.s32.totalorder %s1360_s29, 63  ;;  %v103_v15 = vld [vmem:[%s102_s12] sm:$0x1] }
  0x30   :  { %s116_s26 = scalar_select %p115_p11, %s1360_s29, 0 }
  0x31   :  { %s110_s14 = scalar_lea.vmem %s1810_s1, %s1847_s28  ;;  %p124_p13 = scmp.gt.s32.totalorder %s1362_s30, 0 }
  0x32   :  { %p827_p0 = scmp.lt.s32.totalorder %s1362_s30, 63  ;;  %s1849_s26 = smov (!%p821_p12, %s116_s26), 63  ;;  %v111_v16 = vld [vmem:[%s110_s14] sm:$0x1] }
  0x33   :  { %s1851_s30 = smov (!%p124_p13, %s1362_s30), 0  ;;  %s119_s17 = scalar_lea.vmem %s1810_s1, %s1849_s26  ;;  %v112_v17 = vmax.f32 %v103_v15, %v111_v16 }
  0x34   :  { %s832_s18 = sld [smem:[#allocation4 + $0x84]]  ;;  %s1853_s30 = smov (!%p827_p0, %s1851_s30), 63  ;;  %v120_v18 = vld [vmem:[%s119_s17] sm:$0x1] }
  0x35   :  { %s838_s19 = sld [smem:[#allocation4 + $0x85]]  ;;  %s1425_s20 = sld [smem:[#allocation4 + $0x86]]  ;;  %v121_v19 = vmax.f32 %v112_v17, %v120_v18 }
  0x36   :  { %s128_s29 = scalar_lea.vmem %s1810_s1, %s1853_s30  ;;  %s1430_s22 = sld [smem:[#allocation4 + $0x87]] }
  0x37   :  { %s1432_s23 = sld [smem:[#allocation4 + $0x100]]  ;;  %s1434_s24 = sld [smem:[#allocation4 + $0x101]]  ;;  %v129_v20 = vld [vmem:[%s128_s29] sm:$0x1] }
  0x38   :  { %s1436_s5 = sld [smem:[#allocation4 + $0x102]]  ;;  %s1438_s6 = sld [smem:[#allocation4 + $0x103]]  ;;  %v130_v21 = vmax.f32 %v121_v19, %v129_v20 }
  0x39   :  { %s1440_s7 = sld [smem:[#allocation4 + $0x104]]  ;;  %s1442_s30 = sld [smem:[#allocation4 + $0x105]] }
  0x3a   :  { %p133_p1 = scmp.gt.s32.totalorder %s832_s18, 0  ;;  %p833_p2 = scmp.lt.s32.totalorder %s832_s18, 63 }
  0x3b   :  { %p142_p3 = scmp.gt.s32.totalorder %s838_s19, 0  ;;  %p839_p4 = scmp.lt.s32.totalorder %s838_s19, 63 }
  0x3c   :  { %s1855_s18 = smov (!%p133_p1, %s832_s18), 0  ;;  %p151_p5 = scmp.gt.s32.totalorder %s1425_s20, 0 }
  0x3d   :  { %s1857_s18 = smov (!%p833_p2, %s1855_s18), 63  ;;  %s1859_s19 = smov (!%p142_p3, %s838_s19), 0 }
  0x3e   :  { %s137_s8 = scalar_lea.vmem %s1810_s1, %s1857_s18  ;;  %s1861_s19 = smov (!%p839_p4, %s1859_s19), 63 }
  0x3f   :  { %v138_v22 = vld [vmem:[%s137_s8] sm:$0x1]  ;;  %s152_s9 = scalar_select %p151_p5, %s1425_s20, 0 }
  0x40   :  { %v139_v23 = vmax.f32 %v130_v21, %v138_v22  ;;  %s146_s12 = scalar_lea.vmem %s1810_s1, %s1861_s19  ;;  %p845_p6 = scmp.lt.s32.totalorder %s1425_s20, 63 }
  0x41   :  { %v147_v24 = vld [vmem:[%s146_s12] sm:$0x1]  ;;  %p160_p7 = scmp.gt.s32.totalorder %s1430_s22, 0  ;;  %p851_p8 = scmp.lt.s32.totalorder %s1430_s22, 63 }
  0x42   :  { %v148_v25 = vmax.f32 %v139_v23, %v147_v24  ;;  %s1863_s9 = smov (!%p845_p6, %s152_s9), 63  ;;  %p171_p9 = scmp.gt.s32.totalorder %s1432_s23, 0 }
  0x43   :  { %s1865_s22 = smov (!%p160_p7, %s1430_s22), 0  ;;  %s155_s27 = scalar_lea.vmem %s1810_s1, %s1863_s9 }
  0x44   :  { %v156_v26 = vld [vmem:[%s155_s27] sm:$0x1]  ;;  %s1867_s22 = smov (!%p851_p8, %s1865_s22), 63  ;;  %p857_p10 = scmp.lt.s32.totalorder %s1432_s23, 63 }
  0x45   :  { %v157_v27 = vmax.f32 %v148_v25, %v156_v26  ;;  %s172_s14 = scalar_select %p171_p9, %s1432_s23, 0 }
  0x46   :  { %s164_s17 = scalar_lea.vmem %s1810_s1, %s1867_s22  ;;  %p179_p11 = scmp.gt.s32.totalorder %s1434_s24, 0 }
  0x47   :  { %v165_v28 = vld [vmem:[%s164_s17] sm:$0x1]  ;;  %p863_p12 = scmp.lt.s32.totalorder %s1434_s24, 63  ;;  %s1869_s14 = smov (!%p857_p10, %s172_s14), 63 }
  0x48   :  { %v166_v29 = vmax.f32 %v157_v27, %v165_v28  ;;  %s1871_s24 = smov (!%p179_p11, %s1434_s24), 0  ;;  %s175_s20 = scalar_lea.vmem %s1810_s1, %s1869_s14 }
  0x49   :  { %p188_p13 = scmp.gt.s32.totalorder %s1436_s5, 0  ;;  %s1873_s24 = smov (!%p863_p12, %s1871_s24), 63  ;;  %v176_v30 = vld [vmem:[%s175_s20] sm:$0x1] }
  0x4a   :  { %167 = vst.msk [vmem:[#allocation2 + $0x1] sm:$0x1] %vm93_vm0, %v166_v29  ;;  %s183_s22 = scalar_lea.vmem %s1810_s1, %s1873_s24  ;;  %p869_p0 = scmp.lt.s32.totalorder %s1436_s5, 63 }
  0x4b   :  { %s189_s21 = scalar_select %p188_p13, %s1436_s5, 0  ;;  %v184_v31 = vld [vmem:[%s183_s22] sm:$0x1] }
  0x4c   :  { %p197_p1 = scmp.gt.s32.totalorder %s1438_s6, 0  ;;  %p875_p2 = scmp.lt.s32.totalorder %s1438_s6, 63  ;;  %v185_v32 = vmax.f32 %v176_v30, %v184_v31 }
  0x4d   :  { %s1875_s21 = smov (!%p869_p0, %s189_s21), 63  ;;  %p206_p3 = scmp.gt.s32.totalorder %s1440_s7, 0 }
  0x4e   :  { %s1877_s6 = smov (!%p197_p1, %s1438_s6), 0  ;;  %s192_s25 = scalar_lea.vmem %s1810_s1, %s1875_s21 }
  0x4f   :  { %s1879_s6 = smov (!%p875_p2, %s1877_s6), 63  ;;  %v193_v33 = vld [vmem:[%s192_s25] sm:$0x1]  ;;  %p881_p4 = scmp.lt.s32.totalorder %s1440_s7, 63 }
  0x50   :  { %s207_s8 = scalar_select %p206_p3, %s1440_s7, 0  ;;  %v194_v34 = vmax.f32 %v185_v32, %v193_v33 }
  0x51   :  { %s201_s5 = scalar_lea.vmem %s1810_s1, %s1879_s6  ;;  %p215_p5 = scmp.gt.s32.totalorder %s1442_s30, 0 }
  0x52   :  { %p887_p6 = scmp.lt.s32.totalorder %s1442_s30, 63  ;;  %s1881_s8 = smov (!%p881_p4, %s207_s8), 63  ;;  %v202_v35 = vld [vmem:[%s201_s5] sm:$0x1] }
  0x53   :  { %s1883_s30 = smov (!%p215_p5, %s1442_s30), 0  ;;  %s210_s12 = scalar_lea.vmem %s1810_s1, %s1881_s8  ;;  %v203_v36 = vmax.f32 %v194_v34, %v202_v35 }
  0x54   :  { %s892_s26 = sld [smem:[#allocation4 + $0x106]]  ;;  %s1885_s30 = smov (!%p887_p6, %s1883_s30), 63  ;;  %v211_v37 = vld [vmem:[%s210_s12] sm:$0x1] }
  0x55   :  { %s898_s13 = sld [smem:[#allocation4 + $0x107]]  ;;  %s1496_s27 = sld [smem:[#allocation4 + $0x180]]  ;;  %v212_v38 = vmax.f32 %v203_v36, %v211_v37 }
  0x56   :  { %s219_s7 = scalar_lea.vmem %s1810_s1, %s1885_s30  ;;  %s1501_s15 = sld [smem:[#allocation4 + $0x181]] }
  0x57   :  { %s1503_s16 = sld [smem:[#allocation4 + $0x182]]  ;;  %s1505_s17 = sld [smem:[#allocation4 + $0x183]]  ;;  %v220_v39 = vld [vmem:[%s219_s7] sm:$0x1] }
  0x58   :  { %s1507_s18 = sld [smem:[#allocation4 + $0x184]]  ;;  %s1509_s19 = sld [smem:[#allocation4 + $0x185]]  ;;  %v221_v40 = vmax.f32 %v212_v38, %v220_v39 }
  0x59   :  { %s1511_s20 = sld [smem:[#allocation4 + $0x186]]  ;;  %s1513_s30 = sld [smem:[#allocation4 + $0x187]] }
  0x5a   :  { %p224_p7 = scmp.gt.s32.totalorder %s892_s26, 0  ;;  %p893_p8 = scmp.lt.s32.totalorder %s892_s26, 63 }
  0x5b   :  { %p233_p9 = scmp.gt.s32.totalorder %s898_s13, 0  ;;  %p899_p10 = scmp.lt.s32.totalorder %s898_s13, 63 }
  0x5c   :  { %s1887_s26 = smov (!%p224_p7, %s892_s26), 0  ;;  %p244_p11 = scmp.gt.s32.totalorder %s1496_s27, 0 }
  0x5d   :  { %s1889_s26 = smov (!%p893_p8, %s1887_s26), 63  ;;  %s1891_s13 = smov (!%p233_p9, %s898_s13), 0 }
  0x5e   :  { %s228_s29 = scalar_lea.vmem %s1810_s1, %s1889_s26  ;;  %s1893_s13 = smov (!%p899_p10, %s1891_s13), 63 }
  0x5f   :  { %v229_v41 = vld [vmem:[%s228_s29] sm:$0x1]  ;;  %s245_s22 = scalar_select %p244_p11, %s1496_s27, 0 }
  0x60   :  { %v230_v42 = vmax.f32 %v221_v40, %v229_v41  ;;  %s237_s25 = scalar_lea.vmem %s1810_s1, %s1893_s13  ;;  %p905_p12 = scmp.lt.s32.totalorder %s1496_s27, 63 }
  0x61   :  { %v238_v43 = vld [vmem:[%s237_s25] sm:$0x1]  ;;  %p252_p13 = scmp.gt.s32.totalorder %s1501_s15, 0  ;;  %p911_p0 = scmp.lt.s32.totalorder %s1501_s15, 63 }
  0x62   :  { %v239_v44 = vmax.f32 %v230_v42, %v238_v43  ;;  %s1895_s22 = smov (!%p905_p12, %s245_s22), 63  ;;  %p261_p1 = scmp.gt.s32.totalorder %s1503_s16, 0 }
  0x63   :  { %s1897_s15 = smov (!%p252_p13, %s1501_s15), 0  ;;  %s248_s9 = scalar_lea.vmem %s1810_s1, %s1895_s22 }
  0x64   :  { %240 = vst.msk [vmem:[#allocation2 + $0x2] sm:$0x1] %vm93_vm0, %v239_v44  ;;  %s1899_s15 = smov (!%p911_p0, %s1897_s15), 63  ;;  %v249_v45 = vld [vmem:[%s248_s9] sm:$0x1]  ;;  %p917_p2 = scmp.lt.s32.totalorder %s1503_s16, 63 }
  0x65   :  { %s262_s5 = scalar_select %p261_p1, %s1503_s16, 0 }
  0x66   :  { %s256_s12 = scalar_lea.vmem %s1810_s1, %s1899_s15  ;;  %p270_p3 = scmp.gt.s32.totalorder %s1505_s17, 0 }
  0x67   :  { %v257_v46 = vld [vmem:[%s256_s12] sm:$0x1]  ;;  %p923_p4 = scmp.lt.s32.totalorder %s1505_s17, 63  ;;  %s1901_s5 = smov (!%p917_p2, %s262_s5), 63 }
  0x68   :  { %v258_v47 = vmax.f32 %v249_v45, %v257_v46  ;;  %s1903_s17 = smov (!%p270_p3, %s1505_s17), 0  ;;  %s265_s27 = scalar_lea.vmem %s1810_s1, %s1901_s5 }
  0x69   :  { %p279_p5 = scmp.gt.s32.totalorder %s1507_s18, 0  ;;  %v266_v48 = vld [vmem:[%s265_s27] sm:$0x1]  ;;  %s1905_s17 = smov (!%p923_p4, %s1903_s17), 63 }
  0x6a   :  { %v267_v49 = vmax.f32 %v258_v47, %v266_v48  ;;  %s274_s15 = scalar_lea.vmem %s1810_s1, %s1905_s17  ;;  %p929_p6 = scmp.lt.s32.totalorder %s1507_s18, 63 }
  0x6b   :  { %s280_s14 = scalar_select %p279_p5, %s1507_s18, 0  ;;  %v275_v50 = vld [vmem:[%s274_s15] sm:$0x1] }
  0x6c   :  { %p288_p7 = scmp.gt.s32.totalorder %s1509_s19, 0  ;;  %p935_p8 = scmp.lt.s32.totalorder %s1509_s19, 63  ;;  %v276_v51 = vmax.f32 %v267_v49, %v275_v50 }
  0x6d   :  { %s1907_s14 = smov (!%p929_p6, %s280_s14), 63  ;;  %p297_p9 = scmp.gt.s32.totalorder %s1511_s20, 0 }
  0x6e   :  { %s1909_s19 = smov (!%p288_p7, %s1509_s19), 0  ;;  %s283_s28 = scalar_lea.vmem %s1810_s1, %s1907_s14 }
  0x6f   :  { %v284_v52 = vld [vmem:[%s283_s28] sm:$0x1]  ;;  %s1911_s19 = smov (!%p935_p8, %s1909_s19), 63  ;;  %p941_p10 = scmp.lt.s32.totalorder %s1511_s20, 63 }
  0x70   :  { %v285_v53 = vmax.f32 %v276_v51, %v284_v52  ;;  %s298_s29 = scalar_select %p297_p9, %s1511_s20, 0 }
  0x71   :  { %s292_s22 = scalar_lea.vmem %s1810_s1, %s1911_s19  ;;  %p306_p11 = scmp.gt.s32.totalorder %s1513_s30, 0 }
  0x72   :  { %v293_v54 = vld [vmem:[%s292_s22] sm:$0x1]  ;;  %p947_p12 = scmp.lt.s32.totalorder %s1513_s30, 63  ;;  %s1913_s29 = smov (!%p941_p10, %s298_s29), 63 }
  0x73   :  { %v294_v55 = vmax.f32 %v285_v53, %v293_v54  ;;  %s1915_s30 = smov (!%p306_p11, %s1513_s30), 0  ;;  %s301_s25 = scalar_lea.vmem %s1810_s1, %s1913_s29 }
  0x74   :  { %s952_s8 = sld [smem:[#allocation4 + $0x200]]  ;;  %v302_v56 = vld [vmem:[%s301_s25] sm:$0x1]  ;;  %s1917_s30 = smov (!%p947_p12, %s1915_s30), 63 }
  0x75   :  { %v303_v57 = vmax.f32 %v294_v55, %v302_v56  ;;  %s958_s24 = sld [smem:[#allocation4 + $0x201]]  ;;  %s1567_s9 = sld [smem:[#allocation4 + $0x202]] }
  0x76   :  { %s310_s20 = scalar_lea.vmem %s1810_s1, %s1917_s30  ;;  %s1572_s10 = sld [smem:[#allocation4 + $0x203]] }
  0x77   :  { %v311_v58 = vld [vmem:[%s310_s20] sm:$0x1]  ;;  %s1574_s11 = sld [smem:[#allocation4 + $0x204]]  ;;  %s1576_s12 = sld [smem:[#allocation4 + $0x205]] }
  0x78   :  { %v312_v59 = vmax.f32 %v303_v57, %v311_v58  ;;  %s1578_s26 = sld [smem:[#allocation4 + $0x206]]  ;;  %s1580_s13 = sld [smem:[#allocation4 + $0x207]] }
  0x79   :  { %s1583_s27 = sld [smem:[#allocation4 + $0x280]]  ;;  %s1585_s30 = sld [smem:[#allocation4 + $0x281]] }
  0x7a   :  { %p317_p13 = scmp.gt.s32.totalorder %s952_s8, 0  ;;  %p953_p0 = scmp.lt.s32.totalorder %s952_s8, 63  ;;  %313 = vst.msk [vmem:[#allocation2 + $0x3] sm:$0x1] %vm93_vm0, %v312_v59 }
  0x7b   :  { %p325_p1 = scmp.gt.s32.totalorder %s958_s24, 0  ;;  %p959_p2 = scmp.lt.s32.totalorder %s958_s24, 63 }
  0x7c   :  { %s1919_s8 = smov (!%p317_p13, %s952_s8), 0  ;;  %p334_p3 = scmp.gt.s32.totalorder %s1567_s9, 0 }
  0x7d   :  { %s1921_s8 = smov (!%p953_p0, %s1919_s8), 63  ;;  %s1923_s24 = smov (!%p325_p1, %s958_s24), 0 }
  0x7e   :  { %s321_s28 = scalar_lea.vmem %s1810_s1, %s1921_s8  ;;  %s1925_s24 = smov (!%p959_p2, %s1923_s24), 63 }
  0x7f   :  { %v322_v2 = vld [vmem:[%s321_s28] sm:$0x1]  ;;  %s335_s23 = scalar_select %p334_p3, %s1567_s9, 0 }
  0x80   :  { %s329_s8 = scalar_lea.vmem %s1810_s1, %s1925_s24  ;;  %p965_p4 = scmp.lt.s32.totalorder %s1567_s9, 63 }
  0x81   :  { %v330_v4 = vld [vmem:[%s329_s8] sm:$0x1]  ;;  %p343_p5 = scmp.gt.s32.totalorder %s1572_s10, 0  ;;  %p971_p6 = scmp.lt.s32.totalorder %s1572_s10, 63 }
  0x82   :  { %v331_v5 = vmax.f32 %v322_v2, %v330_v4  ;;  %s1927_s23 = smov (!%p965_p4, %s335_s23), 63  ;;  %p352_p7 = scmp.gt.s32.totalorder %s1574_s11, 0 }
  0x83   :  { %s1929_s10 = smov (!%p343_p5, %s1572_s10), 0  ;;  %s338_s24 = scalar_lea.vmem %s1810_s1, %s1927_s23 }
  0x84   :  { %v339_v7 = vld [vmem:[%s338_s24] sm:$0x1]  ;;  %s1931_s10 = smov (!%p971_p6, %s1929_s10), 63  ;;  %p977_p8 = scmp.lt.s32.totalorder %s1574_s11, 63 }
  0x85   :  { %v340_v8 = vmax.f32 %v331_v5, %v339_v7  ;;  %s353_s9 = scalar_select %p352_p7, %s1574_s11, 0 }
  0x86   :  { %s347_s14 = scalar_lea.vmem %s1810_s1, %s1931_s10  ;;  %p361_p9 = scmp.gt.s32.totalorder %s1576_s12, 0 }
  0x87   :  { %v348_v9 = vld [vmem:[%s347_s14] sm:$0x1]  ;;  %p983_p10 = scmp.lt.s32.totalorder %s1576_s12, 63  ;;  %s1933_s9 = smov (!%p977_p8, %s353_s9), 63 }
  0x88   :  { %v349_v10 = vmax.f32 %v340_v8, %v348_v9  ;;  %s1935_s12 = smov (!%p361_p9, %s1576_s12), 0  ;;  %s356_s15 = scalar_lea.vmem %s1810_s1, %s1933_s9 }
  0x89   :  { %p370_p11 = scmp.gt.s32.totalorder %s1578_s26, 0  ;;  %v357_v11 = vld [vmem:[%s356_s15] sm:$0x1]  ;;  %s1937_s12 = smov (!%p983_p10, %s1935_s12), 63 }
  0x8a   :  { %v358_v12 = vmax.f32 %v349_v10, %v357_v11  ;;  %s365_s21 = scalar_lea.vmem %s1810_s1, %s1937_s12  ;;  %p989_p12 = scmp.lt.s32.totalorder %s1578_s26, 63 }
  0x8b   :  { %s371_s10 = scalar_select %p370_p11, %s1578_s26, 0  ;;  %v366_v13 = vld [vmem:[%s365_s21] sm:$0x1] }
  0x8c   :  { %p379_p13 = scmp.gt.s32.totalorder %s1580_s13, 0  ;;  %p995_p0 = scmp.lt.s32.totalorder %s1580_s13, 63  ;;  %v367_v14 = vmax.f32 %v358_v12, %v366_v13 }
  0x8d   :  { %s1939_s10 = smov (!%p989_p12, %s371_s10), 63  ;;  %p390_p1 = scmp.gt.s32.totalorder %s1583_s27, 0 }
  0x8e   :  { %s1941_s13 = smov (!%p379_p13, %s1580_s13), 0  ;;  %s374_s17 = scalar_lea.vmem %s1810_s1, %s1939_s10 }
  0x8f   :  { %v375_v15 = vld [vmem:[%s374_s17] sm:$0x1]  ;;  %s1943_s13 = smov (!%p995_p0, %s1941_s13), 63  ;;  %p1001_p2 = scmp.lt.s32.totalorder %s1583_s27, 63 }
  0x90   :  { %v376_v16 = vmax.f32 %v367_v14, %v375_v15  ;;  %s391_s18 = scalar_select %p390_p1, %s1583_s27, 0 }
  0x91   :  { %s383_s22 = scalar_lea.vmem %s1810_s1, %s1943_s13  ;;  %p398_p3 = scmp.gt.s32.totalorder %s1585_s30, 0 }
  0x92   :  { %v384_v17 = vld [vmem:[%s383_s22] sm:$0x1]  ;;  %p1007_p4 = scmp.lt.s32.totalorder %s1585_s30, 63  ;;  %s1945_s18 = smov (!%p1001_p2, %s391_s18), 63 }
  0x93   :  { %v385_v18 = vmax.f32 %v376_v16, %v384_v17  ;;  %s1947_s30 = smov (!%p398_p3, %s1585_s30), 0  ;;  %s394_s25 = scalar_lea.vmem %s1810_s1, %s1945_s18 }
  0x94   :  { %s1012_s8 = sld [smem:[#allocation4 + $0x282]]  ;;  %s1949_s30 = smov (!%p1007_p4, %s1947_s30), 63  ;;  %v395_v19 = vld [vmem:[%s394_s25] sm:$0x1] }
  0x95   :  { %386 = vst.msk [vmem:[#allocation2 + $0x4] sm:$0x1] %vm93_vm0, %v385_v18  ;;  %s1018_s2 = sld [smem:[#allocation4 + $0x283]]  ;;  %s1651_s5 = sld [smem:[#allocation4 + $0x284]] }
  0x96   :  { %s402_s27 = scalar_lea.vmem %s1810_s1, %s1949_s30  ;;  %s1656_s9 = sld [smem:[#allocation4 + $0x285]] }
  0x97   :  { %s1658_s19 = sld [smem:[#allocation4 + $0x286]]  ;;  %s1660_s20 = sld [smem:[#allocation4 + $0x287]]  ;;  %v403_v20 = vld [vmem:[%s402_s27] sm:$0x1] }
  0x98   :  { %s1662_s14 = sld [smem:[#allocation4 + $0x300]]  ;;  %s1664_s6 = sld [smem:[#allocation4 + $0x301]]  ;;  %v404_v21 = vmax.f32 %v395_v19, %v403_v20 }
  0x99   :  { %s1666_s7 = sld [smem:[#allocation4 + $0x302]]  ;;  %s1668_s30 = sld [smem:[#allocation4 + $0x303]] }
  0x9a   :  { %p407_p5 = scmp.gt.s32.totalorder %s1012_s8, 0  ;;  %p1013_p6 = scmp.lt.s32.totalorder %s1012_s8, 63 }
  0x9b   :  { %p416_p7 = scmp.gt.s32.totalorder %s1018_s2, 0  ;;  %p1019_p8 = scmp.lt.s32.totalorder %s1018_s2, 63 }
  0x9c   :  { %s1951_s8 = smov (!%p407_p5, %s1012_s8), 0  ;;  %p425_p9 = scmp.gt.s32.totalorder %s1651_s5, 0 }
  0x9d   :  { %s1953_s8 = smov (!%p1013_p6, %s1951_s8), 63  ;;  %s1955_s2 = smov (!%p416_p7, %s1018_s2), 0 }
  0x9e   :  { %s411_s11 = scalar_lea.vmem %s1810_s1, %s1953_s8  ;;  %s1957_s2 = smov (!%p1019_p8, %s1955_s2), 63 }
  0x9f   :  { %v412_v22 = vld [vmem:[%s411_s11] sm:$0x1]  ;;  %s426_s16 = scalar_select %p425_p9, %s1651_s5, 0 }
  0xa0   :  { %v413_v23 = vmax.f32 %v404_v21, %v412_v22  ;;  %s420_s29 = scalar_lea.vmem %s1810_s1, %s1957_s2  ;;  %p1025_p10 = scmp.lt.s32.totalorder %s1651_s5, 63 }
  0xa1   :  { %v421_v24 = vld [vmem:[%s420_s29] sm:$0x1]  ;;  %p434_p11 = scmp.gt.s32.totalorder %s1656_s9, 0  ;;  %p1031_p12 = scmp.lt.s32.totalorder %s1656_s9, 63 }
  0xa2   :  { %v422_v25 = vmax.f32 %v413_v23, %v421_v24  ;;  %s1959_s16 = smov (!%p1025_p10, %s426_s16), 63  ;;  %p443_p13 = scmp.gt.s32.totalorder %s1658_s19, 0 }
  0xa3   :  { %s1961_s9 = smov (!%p434_p11, %s1656_s9), 0  ;;  %s429_s12 = scalar_lea.vmem %s1810_s1, %s1959_s16 }
  0xa4   :  { %v430_v26 = vld [vmem:[%s429_s12] sm:$0x1]  ;;  %s1963_s9 = smov (!%p1031_p12, %s1961_s9), 63  ;;  %p1037_p0 = scmp.lt.s32.totalorder %s1658_s19, 63 }
  0xa5   :  { %v431_v27 = vmax.f32 %v422_v25, %v430_v26  ;;  %s444_s26 = scalar_select %p443_p13, %s1658_s19, 0 }
  0xa6   :  { %s438_s0 = scalar_lea.vmem %s1810_s1, %s1963_s9  ;;  %p452_p1 = scmp.gt.s32.totalorder %s1660_s20, 0 }
  0xa7   :  { %v439_v28 = vld [vmem:[%s438_s0] sm:$0x1]  ;;  %p1043_p2 = scmp.lt.s32.totalorder %s1660_s20, 63  ;;  %s1965_s26 = smov (!%p1037_p0, %s444_s26), 63 }
  0xa8   :  { %v440_v29 = vmax.f32 %v431_v27, %v439_v28  ;;  %s1967_s20 = smov (!%p452_p1, %s1660_s20), 0  ;;  %s447_s2 = scalar_lea.vmem %s1810_s1, %s1965_s26 }
  0xa9   :  { %p463_p3 = scmp.gt.s32.totalorder %s1662_s14, 0  ;;  %v448_v30 = vld [vmem:[%s447_s2] sm:$0x1]  ;;  %s1969_s20 = smov (!%p1043_p2, %s1967_s20), 63 }
  0xaa   :  { %v449_v31 = vmax.f32 %v440_v29, %v448_v30  ;;  %s456_s27 = scalar_lea.vmem %s1810_s1, %s1969_s20  ;;  %p1049_p4 = scmp.lt.s32.totalorder %s1662_s14, 63 }
  0xab   :  { %s464_s5 = scalar_select %p463_p3, %s1662_s14, 0  ;;  %v457_v32 = vld [vmem:[%s456_s27] sm:$0x1] }
  0xac   :  { %p471_p5 = scmp.gt.s32.totalorder %s1664_s6, 0  ;;  %p1055_p6 = scmp.lt.s32.totalorder %s1664_s6, 63  ;;  %v458_v33 = vmax.f32 %v449_v31, %v457_v32 }
  0xad   :  { %s1971_s5 = smov (!%p1049_p4, %s464_s5), 63  ;;  %p480_p7 = scmp.gt.s32.totalorder %s1666_s7, 0 }
  0xae   :  { %s1973_s6 = smov (!%p471_p5, %s1664_s6), 0  ;;  %459 = vst.msk [vmem:[#allocation2 + $0x5] sm:$0x1] %vm93_vm0, %v458_v33  ;;  %s467_s15 = scalar_lea.vmem %s1810_s1, %s1971_s5 }
  0xaf   :  { %s1975_s6 = smov (!%p1055_p6, %s1973_s6), 63  ;;  %p1061_p8 = scmp.lt.s32.totalorder %s1666_s7, 63  ;;  %v468_v34 = vld [vmem:[%s467_s15] sm:$0x1] }
  0xb0   :  { %s481_s10 = scalar_select %p480_p7, %s1666_s7, 0 }
  0xb1   :  { %s475_s14 = scalar_lea.vmem %s1810_s1, %s1975_s6  ;;  %p489_p9 = scmp.gt.s32.totalorder %s1668_s30, 0 }
  0xb2   :  { %p1067_p10 = scmp.lt.s32.totalorder %s1668_s30, 63  ;;  %s1977_s10 = smov (!%p1061_p8, %s481_s10), 63  ;;  %v476_v35 = vld [vmem:[%s475_s14] sm:$0x1] }
  0xb3   :  { %s1979_s30 = smov (!%p489_p9, %s1668_s30), 0  ;;  %s484_s28 = scalar_lea.vmem %s1810_s1, %s1977_s10  ;;  %v477_v36 = vmax.f32 %v468_v34, %v476_v35 }
  0xb4   :  { %s1072_s29 = sld [smem:[#allocation4 + $0x304]]  ;;  %s1981_s30 = smov (!%p1067_p10, %s1979_s30), 63  ;;  %v485_v37 = vld [vmem:[%s484_s28] sm:$0x1] }
  0xb5   :  { %s1078_s17 = sld [smem:[#allocation4 + $0x305]]  ;;  %s1722_s18 = sld [smem:[#allocation4 + $0x306]]  ;;  %v486_v38 = vmax.f32 %v477_v36, %v485_v37 }
  0xb6   :  { %s493_s7 = scalar_lea.vmem %s1810_s1, %s1981_s30  ;;  %s1727_s26 = sld [smem:[#allocation4 + $0x307]] }
  0xb7   :  { %s1729_s22 = sld [smem:[#allocation4 + $0x380]]  ;;  %s1731_s23 = sld [smem:[#allocation4 + $0x381]]  ;;  %v494_v39 = vld [vmem:[%s493_s7] sm:$0x1] }
  0xb8   :  { %s1733_s0 = sld [smem:[#allocation4 + $0x382]]  ;;  %s1735_s25 = sld [smem:[#allocation4 + $0x383]]  ;;  %v495_v40 = vmax.f32 %v486_v38, %v494_v39 }
  0xb9   :  { %s1737_s8 = sld [smem:[#allocation4 + $0x384]]  ;;  %s1739_s30 = sld [smem:[#allocation4 + $0x385]] }
  0xba   :  { %p498_p11 = scmp.gt.s32.totalorder %s1072_s29, 0  ;;  %p1073_p12 = scmp.lt.s32.totalorder %s1072_s29, 63 }
  0xbb   :  { %p507_p13 = scmp.gt.s32.totalorder %s1078_s17, 0  ;;  %p1079_p0 = scmp.lt.s32.totalorder %s1078_s17, 63 }
  0xbc   :  { %s1983_s29 = smov (!%p498_p11, %s1072_s29), 0  ;;  %p516_p1 = scmp.gt.s32.totalorder %s1722_s18, 0 }
  0xbd   :  { %s1985_s29 = smov (!%p1073_p12, %s1983_s29), 63  ;;  %s1987_s17 = smov (!%p507_p13, %s1078_s17), 0 }
  0xbe   :  { %s502_s24 = scalar_lea.vmem %s1810_s1, %s1985_s29  ;;  %s1989_s17 = smov (!%p1079_p0, %s1987_s17), 63 }
  0xbf   :  { %v503_v41 = vld [vmem:[%s502_s24] sm:$0x1]  ;;  %s517_s13 = scalar_select %p516_p1, %s1722_s18, 0 }
  0xc0   :  { %v504_v42 = vmax.f32 %v495_v40, %v503_v41  ;;  %s511_s19 = scalar_lea.vmem %s1810_s1, %s1989_s17  ;;  %p1085_p2 = scmp.lt.s32.totalorder %s1722_s18, 63 }
  0xc1   :  { %v512_v43 = vld [vmem:[%s511_s19] sm:$0x1]  ;;  %p525_p3 = scmp.gt.s32.totalorder %s1727_s26, 0  ;;  %p1091_p4 = scmp.lt.s32.totalorder %s1727_s26, 63 }
  0xc2   :  { %v513_v44 = vmax.f32 %v504_v42, %v512_v43  ;;  %s1991_s13 = smov (!%p1085_p2, %s517_s13), 63  ;;  %p536_p5 = scmp.gt.s32.totalorder %s1729_s22, 0 }
  0xc3   :  { %s1993_s26 = smov (!%p525_p3, %s1727_s26), 0  ;;  %s520_s11 = scalar_lea.vmem %s1810_s1, %s1991_s13 }
  0xc4   :  { %v521_v45 = vld [vmem:[%s520_s11] sm:$0x1]  ;;  %s1995_s26 = smov (!%p1091_p4, %s1993_s26), 63  ;;  %p1097_p6 = scmp.lt.s32.totalorder %s1729_s22, 63 }
  0xc5   :  { %v522_v46 = vmax.f32 %v513_v44, %v521_v45  ;;  %s537_s20 = scalar_select %p536_p5, %s1729_s22, 0 }
  0xc6   :  { %s529_s21 = scalar_lea.vmem %s1810_s1, %s1995_s26  ;;  %p544_p7 = scmp.gt.s32.totalorder %s1731_s23, 0 }
  0xc7   :  { %v530_v47 = vld [vmem:[%s529_s21] sm:$0x1]  ;;  %p1103_p8 = scmp.lt.s32.totalorder %s1731_s23, 63  ;;  %s1997_s20 = smov (!%p1097_p6, %s537_s20), 63 }
  0xc8   :  { %v531_v48 = vmax.f32 %v522_v46, %v530_v47  ;;  %s1999_s23 = smov (!%p544_p7, %s1731_s23), 0  ;;  %s540_s17 = scalar_lea.vmem %s1810_s1, %s1997_s20 }
  0xc9   :  { %p553_p9 = scmp.gt.s32.totalorder %s1733_s0, 0  ;;  %s2001_s23 = smov (!%p1103_p8, %s1999_s23), 63  ;;  %v541_v49 = vld [vmem:[%s540_s17] sm:$0x1] }
  0xca   :  { %532 = vst.msk [vmem:[#allocation2 + $0x6] sm:$0x1] %vm93_vm0, %v531_v48  ;;  %s548_s7 = scalar_lea.vmem %s1810_s1, %s2001_s23  ;;  %p1109_p10 = scmp.lt.s32.totalorder %s1733_s0, 63 }
  0xcb   :  { %s554_s18 = scalar_select %p553_p9, %s1733_s0, 0  ;;  %v549_v50 = vld [vmem:[%s548_s7] sm:$0x1] }
  0xcc   :  { %p562_p11 = scmp.gt.s32.totalorder %s1735_s25, 0  ;;  %p1115_p12 = scmp.lt.s32.totalorder %s1735_s25, 63  ;;  %v550_v51 = vmax.f32 %v541_v49, %v549_v50 }
  0xcd   :  { %s2003_s18 = smov (!%p1109_p10, %s554_s18), 63  ;;  %p571_p13 = scmp.gt.s32.totalorder %s1737_s8, 0 }
  0xce   :  { %s2005_s25 = smov (!%p562_p11, %s1735_s25), 0  ;;  %s557_s2 = scalar_lea.vmem %s1810_s1, %s2003_s18 }
  0xcf   :  { %s2007_s25 = smov (!%p1115_p12, %s2005_s25), 63  ;;  %v558_v52 = vld [vmem:[%s557_s2] sm:$0x1]  ;;  %p1121_p0 = scmp.lt.s32.totalorder %s1737_s8, 63 }
  0xd0   :  { %s572_s5 = scalar_select %p571_p13, %s1737_s8, 0  ;;  %v559_v53 = vmax.f32 %v550_v51, %v558_v52 }
  0xd1   :  { %s566_s0 = scalar_lea.vmem %s1810_s1, %s2007_s25  ;;  %p580_p1 = scmp.gt.s32.totalorder %s1739_s30, 0 }
  0xd2   :  { %p1127_p2 = scmp.lt.s32.totalorder %s1739_s30, 63  ;;  %s2009_s5 = smov (!%p1121_p0, %s572_s5), 63  ;;  %v567_v54 = vld [vmem:[%s566_s0] sm:$0x1] }
  0xd3   :  { %s2011_s30 = smov (!%p580_p1, %s1739_s30), 0  ;;  %s575_s9 = scalar_lea.vmem %s1810_s1, %s2009_s5  ;;  %v568_v55 = vmax.f32 %v559_v53, %v567_v54 }
  0xd4   :  { %s1132_s19 = sld [smem:[#allocation4 + $0x386]]  ;;  %s2013_s30 = smov (!%p1127_p2, %s2011_s30), 63  ;;  %v576_v56 = vld [vmem:[%s575_s9] sm:$0x1] }
  0xd5   :  { %s1138_s15 = sld [smem:[#allocation4 + $0x387]]  ;;  %s584_s25 = scalar_lea.vmem %s1810_s1, %s2013_s30  ;;  %v577_v57 = vmax.f32 %v568_v55, %v576_v56 }
  0xd6   :  { %v585_v58 = vld [vmem:[%s584_s25] sm:$0x1] }
  0xd7   :  { %v586_v59 = vmax.f32 %v577_v57, %v585_v58 }
  0xda   :  { %p589_p3 = scmp.gt.s32.totalorder %s1132_s19, 0  ;;  %p1133_p4 = scmp.lt.s32.totalorder %s1132_s19, 63 }
  0xdb   :  { %p598_p5 = scmp.gt.s32.totalorder %s1138_s15, 0  ;;  %p1139_p6 = scmp.lt.s32.totalorder %s1138_s15, 63 }
  0xdc   :  { %s2015_s19 = smov (!%p589_p3, %s1132_s19), 0 }
  0xdd   :  { %s2017_s19 = smov (!%p1133_p4, %s2015_s19), 63  ;;  %s2019_s15 = smov (!%p598_p5, %s1138_s15), 0 }
  0xde   :  { %s593_s14 = scalar_lea.vmem %s1810_s1, %s2017_s19  ;;  %s2021_s15 = smov (!%p1139_p6, %s2019_s15), 63 }
  0xdf   :  { %v594_v60 = vld [vmem:[%s593_s14] sm:$0x1]  ;;  %s602_s30 = scalar_lea.vmem %s1810_s1, %s2021_s15 }
  0xe0   :  { %v595_v61 = vmax.f32 %v586_v59, %v594_v60  ;;  %v603_v62 = vld [vmem:[%s602_s30] sm:$0x1] }
  0xe2   :  { %v604_v63 = vmax.f32 %v595_v61, %v603_v62 }
  0xe4   :  { %605 = vst.msk [vmem:[#allocation2 + $0x7] sm:$0x1] %vm93_vm0, %v604_v63 }
  0xeb   :  { %v606_v0 = vld [vmem:[#allocation2] sm:$0xff] }
  0xec   :  { %1288 = vmatmul.mubr.msk.f32.vlgmr.msra.gmra.mrb[0].mxu0 %vm618_vm2, %v606_v0 }
 0x1bf   :  { %v688_v2 = vpop.f32.mrb[0].mxu0 }
 0x1c0   :  { %v1289_v3 = vpop.f32.mrb[1].mxu0  ;;  %v689_v4 = vadd.f32 %v1144_v1, %v688_v2 }
 0x1c2   :  { %692 = vst [vmem:[%s1813_s4] sm:$0xff] %v689_v4 }

</bundles_post_ra>
